<compile_context>
chip_gen: v6e
topology: v6e:2x2x1
jax: 0.10.0
libtpu: 0.0.40
codegen_flags: <defaults>
</compile_context>

<pallas_src>
import functools

import jax
import jax.numpy as jnp
from jax import lax
from jax.experimental import pallas as pl
from jax.experimental.pallas import tpu as pltpu


def _self_attn_kernel(xq_ref, xkv_ref, wq_ref, bq_ref, wkt_ref, bk_ref,
                      wvt_ref, bv_ref, bns_ref, bnb_ref, o_ref,
                      k_scr, v_scr, *, c_out, n_real, n_pad):
    # xq_ref : (1, C, TQ) f32 query tile of x (residual path + Q projection input)
    # xkv_ref: (1, C, Np) bf16 full spatial extent of x for this batch element
    # k_scr  : (C8, Np)  bf16 scratch   v_scr: (C+8, Np) bf16 scratch (row C = ones)

    # ---- hoisted: K / V(+denominator-row) projections, once per batch segment ----
    @pl.when(pl.program_id(2) == 0)
    def _():
        x_b = xkv_ref[0]                                                   # (C, Np) bf16
        k = jnp.dot(wkt_ref[...], x_b,
                    preferred_element_type=jnp.float32) + bk_ref[...]      # (C8, Np)
        k_scr[...] = k.astype(jnp.bfloat16)
        v = jnp.dot(wvt_ref[...], x_b,
                    preferred_element_type=jnp.float32)                    # (C+8, Np)
        bias = bv_ref[...]                                                 # (C+8, 1)
        if n_pad > 0:
            # Zero the bias (including the ones-row) on padded key columns so padded
            # keys contribute nothing to the attention numerator or denominator.
            valid = lax.broadcasted_iota(jnp.int32, (1, n_real + n_pad), 1) < n_real
            bias = jnp.where(valid, bias, 0.0)
        v_scr[...] = (v + bias).astype(jnp.bfloat16)

    # ---- per query tile ----
    xq = xq_ref[0]                                                         # (C, TQ) f32
    xq_t = xq.T.astype(jnp.bfloat16)                                       # (TQ, C)
    q = jnp.dot(xq_t, wq_ref[...],
                preferred_element_type=jnp.float32) + bq_ref[...]          # (TQ, C8)

    s = jnp.dot(q.astype(jnp.bfloat16), k_scr[...],
                preferred_element_type=jnp.float32)                        # (TQ, Np) f32
    # Softmax over keys, normalization deferred; single bf16 probability slab.
    p = jnp.exp((s - jnp.max(s, axis=-1, keepdims=True)).astype(jnp.bfloat16))

    # out_ext[c, i] = sum_j v_ext[c, j] * p[i, j]; row `c_out` carries the row sums.
    dn = (((1,), (1,)), ((), ()))
    out_ext = lax.dot_general(v_scr[...], p, dn,
                              preferred_element_type=jnp.float32)          # (C+8, TQ)
    inv_l = pl.reciprocal(out_ext[c_out:c_out + 1], approx=True)           # (1, TQ) EUP

    # Epilogue: deferred softmax scale + (folded gamma/BN) residual + ReLU.
    y = out_ext[:c_out] * inv_l + xq * bns_ref[...] + bnb_ref[...]         # (C, TQ)
    o_ref[0] = jnp.maximum(y, 0.0).astype(o_ref.dtype)


def _pick_tq(n_pad_total, C, C8):
    """Largest lane-aligned query tile whose live set fits a conservative VMEM budget."""
    budget = 20 * 1024 * 1024
    for tq in (512, 256, 128):
        if tq > n_pad_total or n_pad_total % tq:
            continue
        est = (tq * n_pad_total * (4 + 2)              # s (f32) + p (bf16) slabs
               + 2 * 2 * C * n_pad_total               # double-buffered bf16 xkv block
               + 2 * n_pad_total * (C8 + C + 8)        # bf16 K / V scratch
               + 4 * 4 * C * tq)                       # xq / out f32 double buffers
        if est <= budget:
            return tq
    return 128


def self_attention_pallas(x_nchw, params):
    """x_nchw: (B, C, H, W) float32. Returns (B, C, H, W) float32."""
    B, C, H, W = x_nchw.shape
    N = H * W
    C8 = params["wq"].shape[1]
    Co = params["wv"].shape[1]
    assert Co == C, "residual + view(C, H, W) requires out_channels == in_channels"

    # NCHW flattened to channel-major (B, C, N); pad spatial axis to a lane multiple.
    Np = ((N + 127) // 128) * 128
    x_f32 = x_nchw.reshape(B, C, N).astype(jnp.float32)
    if Np != N:
        x_f32 = jnp.pad(x_f32, ((0, 0), (0, 0), (0, Np - N)))
    x_bf = x_f32.astype(jnp.bfloat16)                  # bf16 copy for K/V/Q matmul operand

    tq = _pick_tq(Np, C, C8)
    n_qt = Np // tq
    # Megacore: keep >= 2 parallel iterations even at B == 1 by splitting query tiles.
    n_split = 2 if (B == 1 and n_qt % 2 == 0) else 1
    nq_inner = n_qt // n_split

    # Fold gamma and the eval-mode BN scale into the value projection; append a
    # ones-row (zero weights, bias 1) so the output matmul also produces row sums.
    d = params["gamma"][0, 0] * params["bn_scale"]                     # (1, C)
    wq_b = params["wq"].astype(jnp.bfloat16)                           # (C, C8)
    wkt_b = params["wk"].T.astype(jnp.bfloat16)                        # (C8, C)
    wvt = (params["wv"] * d).T                                         # (C, C)  folded
    wvt_ext = jnp.concatenate([wvt, jnp.zeros((8, C), jnp.float32)], 0).astype(jnp.bfloat16)
    bq = params["bq"]                                                  # (1, C8)
    bk = params["bk"].T                                                # (C8, 1)
    bv = (params["bv"] * d).T                                          # (C, 1)  folded
    ones_row_bias = jnp.zeros((8, 1), jnp.float32).at[0, 0].set(1.0)
    bv_ext = jnp.concatenate([bv, ones_row_bias], 0)                   # (C+8, 1)
    bns = params["bn_scale"].T                                         # (C, 1)
    bnb = params["bn_shift"].T                                         # (C, 1)

    kernel = functools.partial(_self_attn_kernel,
                               c_out=C, n_real=N, n_pad=Np - N)

    qt_idx = lambda b, s, qi: (b, 0, s * nq_inner + qi)
    full = lambda shape: pl.BlockSpec(shape, lambda b, s, qi, n=len(shape): (0,) * n)

    out = pl.pallas_call(
        kernel,
        out_shape=jax.ShapeDtypeStruct((B, C, Np), jnp.float32),
        grid=(B, n_split, nq_inner),
        in_specs=[
            pl.BlockSpec((1, C, tq), qt_idx),                       # x query tile (f32)
            pl.BlockSpec((1, C, Np), lambda b, s, qi: (b, 0, 0)),   # x keys/values (bf16)
            full((C, C8)), full((1, C8)),                           # wq, bq
            full((C8, C)), full((C8, 1)),                           # wk^T, bk
            full((C + 8, C)), full((C + 8, 1)),                     # folded wv^T(+ones), bv
            full((C, 1)), full((C, 1)),                             # bn scale / shift
        ],
        out_specs=pl.BlockSpec((1, C, tq), qt_idx),
        scratch_shapes=[
            pltpu.VMEM((C8, Np), jnp.bfloat16),                     # K scratch
            pltpu.VMEM((C + 8, Np), jnp.bfloat16),                  # V(+ones-row) scratch
        ],
        compiler_params=pltpu.CompilerParams(
            dimension_semantics=("parallel", "parallel", "arbitrary"),
            vmem_limit_bytes=40 * 1024 * 1024),
    )(x_f32, x_bf, wq_b, bq, wkt_b, bk, wvt_ext, bv_ext, bns, bnb)

    if Np != N:
        out = out[:, :, :N]
    return out.reshape(B, C, H, W)


def make_params(key, in_channels, out_channels):
    """Deterministic parameter init mirroring the PyTorch module's __init__."""
    C, Co = in_channels, out_channels
    C8 = Co // 8
    k_wq, k_wk, k_wv, k_bq, k_bk, k_bv = jax.random.split(key, 6)

    # kaiming_normal_ for 1x1 conv: std = sqrt(2 / fan_in), fan_in = C.
    std = jnp.sqrt(2.0 / C)
    # Stored as (C_in, C_out) so y = x @ W matches the 1x1 conv over channels.
    wq = jax.random.normal(k_wq, (C, C8), jnp.float32) * std
    wk = jax.random.normal(k_wk, (C, C8), jnp.float32) * std
    wv = jax.random.normal(k_wv, (C, Co), jnp.float32) * std
    # Conv bias default init: U(-1/sqrt(fan_in), 1/sqrt(fan_in)).
    bnd = 1.0 / jnp.sqrt(C)
    bq = jax.random.uniform(k_bq, (1, C8), jnp.float32, -bnd, bnd)
    bk = jax.random.uniform(k_bk, (1, C8), jnp.float32, -bnd, bnd)
    bv = jax.random.uniform(k_bv, (1, Co), jnp.float32, -bnd, bnd)

    # gamma initialized to zero exactly as in the module.
    gamma = jnp.zeros((1, 1), jnp.float32)

    # BatchNorm (eval mode): weight=1, bias=0, running_mean=0, running_var=1.
    eps = 1e-5
    bn_scale = jnp.full((1, Co), 1.0 / jnp.sqrt(1.0 + eps), jnp.float32)
    bn_shift = jnp.zeros((1, Co), jnp.float32)

    return dict(wq=wq, bq=bq, wk=wk, bk=bk, wv=wv, bv=bv,
                gamma=gamma, bn_scale=bn_scale, bn_shift=bn_shift)


def self_attention_ref(x_nchw, params, mixed_precision=False):
    """Pure-JAX reference (independent (B, N, C) formulation).

    mixed_precision=True mirrors the kernel's bf16-operand / f32-accumulation matmuls
    and bf16 exp, so the comparison isolates structural correctness."""
    B, C, H, W = x_nchw.shape
    N = H * W
    f32 = jnp.float32
    cast = (lambda a: a.astype(jnp.bfloat16)) if mixed_precision else (lambda a: a)

    x = jnp.transpose(x_nchw, (0, 2, 3, 1)).reshape(B, N, C).astype(f32)
    q = jnp.einsum("bnc,cd->bnd", cast(x), cast(params["wq"]),
                   preferred_element_type=f32) + params["bq"]
    k = jnp.einsum("bnc,cd->bnd", cast(x), cast(params["wk"]),
                   preferred_element_type=f32) + params["bk"]
    v = jnp.einsum("bnc,cd->bnd", cast(x), cast(params["wv"]),
                   preferred_element_type=f32) + params["bv"]
    s = jnp.einsum("bic,bjc->bij", cast(q), cast(k), preferred_element_type=f32)
    p = jnp.exp(cast(s - jnp.max(s, axis=-1, keepdims=True)))
    l = jnp.sum(p.astype(f32), axis=-1, keepdims=True)
    out = jnp.einsum("bij,bjc->bic", cast(p), cast(v),
                     preferred_element_type=f32) / l
    y = params["gamma"][0, 0] * out + x
    y = y * params["bn_scale"] + params["bn_shift"]
    y = jnp.maximum(y, 0.0)
    return jnp.transpose(y.reshape(B, H, W, C), (0, 3, 1, 2))


if __name__ == "__main__":
    # out_channels must equal in_channels (residual + view) and be >= 8
    # (out_channels // 8 >= 1): use C = 32, spatial 16x16 -> N = 256.
    B, C, H, W = 2, 32, 16, 16
    key = jax.random.PRNGKey(0)
    k_x, k_p, k_x2 = jax.random.split(key, 3)
    x = jax.random.normal(k_x, (B, C, H, W), jnp.float32)
    params = make_params(k_p, in_channels=C, out_channels=C)

    # 1) Faithful module init (gamma == 0): attention branch contributes zero,
    #    so the kernel must match the pure-f32 reference tightly.
    out = jax.block_until_ready(self_attention_pallas(x, params))
    ref = self_attention_ref(x, params)
    assert out.shape == (B, C, H, W)
    assert jnp.allclose(out, ref, atol=1e-4, rtol=1e-4), "mismatch vs reference (gamma=0)"

    # 2) Non-zero gamma exercises the full attention path (bf16 matmuls, bf16 exp,
    #    approx reciprocal), compared against the mixed-precision reference.
    params_g = dict(params, gamma=jnp.full((1, 1), 0.75, jnp.float32))
    out_g = jax.block_until_ready(self_attention_pallas(x, params_g))
    ref_g = self_attention_ref(x, params_g, mixed_precision=True)
    assert jnp.allclose(out_g, ref_g, atol=3e-2, rtol=3e-2), "mismatch vs reference (gamma!=0)"

    # 3) Non-lane-aligned spatial size (N = 100 -> padded to 128) exercises the
    #    key-padding / masking path and the B == 1 grid configuration.
    x2 = jax.random.normal(k_x2, (1, C, 10, 10), jnp.float32)
    out_p = jax.block_until_ready(self_attention_pallas(x2, params_g))
    ref_p = self_attention_ref(x2, params_g, mixed_precision=True)
    assert out_p.shape == (1, C, 10, 10)
    assert jnp.allclose(out_p, ref_p, atol=3e-2, rtol=3e-2), "mismatch vs reference (padded N)"

    print("KERNEL_OK")
</pallas_src>

<mosaic_0001>
module attributes {stable_mosaic.version = 11 : i64} {
  func.func @_self_attn_kernel(%arg0: i32, %arg1: i32, %arg2: i32, %arg3: memref<1x32x256xf32, #tpu.memory_space<vmem>>, %arg4: memref<1x32x256xbf16, #tpu.memory_space<vmem>>, %arg5: memref<32x4xbf16, #tpu.memory_space<vmem>>, %arg6: memref<1x4xf32, #tpu.memory_space<vmem>>, %arg7: memref<4x32xbf16, #tpu.memory_space<vmem>>, %arg8: memref<4x1xf32, #tpu.memory_space<vmem>>, %arg9: memref<40x32xbf16, #tpu.memory_space<vmem>>, %arg10: memref<40x1xf32, #tpu.memory_space<vmem>>, %arg11: memref<32x1xf32, #tpu.memory_space<vmem>>, %arg12: memref<32x1xf32, #tpu.memory_space<vmem>>, %arg13: memref<1x32x256xf32, #tpu.memory_space<vmem>>, %arg14: memref<4x256xbf16, #tpu.memory_space<vmem>>, %arg15: memref<40x256xbf16, #tpu.memory_space<vmem>>) attributes {dimension_semantics = [#tpu.dimension_semantics<parallel>, #tpu.dimension_semantics<parallel>, #tpu.dimension_semantics<arbitrary>], iteration_bounds = array<i64: 2, 1, 1>, scalar_prefetch = 0 : i64, scratch_operands = 2 : i64, tpu.core_type = #tpu.core_type<tc>, window_params = [{transform_indices = @transform_0, window_bounds = array<i64: 1, 32, 256>}, {transform_indices = @transform_1, window_bounds = array<i64: 1, 32, 256>}, {pipeline_mode = #tpu.pipeline_mode<synchronous>, transform_indices = @transform_2, window_bounds = array<i64: 32, 4>}, {pipeline_mode = #tpu.pipeline_mode<synchronous>, transform_indices = @transform_3, window_bounds = array<i64: 1, 4>}, {pipeline_mode = #tpu.pipeline_mode<synchronous>, transform_indices = @transform_4, window_bounds = array<i64: 4, 32>}, {pipeline_mode = #tpu.pipeline_mode<synchronous>, transform_indices = @transform_5, window_bounds = array<i64: 4, 1>}, {pipeline_mode = #tpu.pipeline_mode<synchronous>, transform_indices = @transform_6, window_bounds = array<i64: 40, 32>}, {pipeline_mode = #tpu.pipeline_mode<synchronous>, transform_indices = @transform_7, window_bounds = array<i64: 40, 1>}, {pipeline_mode = #tpu.pipeline_mode<synchronous>, transform_indices = @transform_8, window_bounds = array<i64: 32, 1>}, {pipeline_mode = #tpu.pipeline_mode<synchronous>, transform_indices = @transform_9, window_bounds = array<i64: 32, 1>}, {transform_indices = @transform_10, window_bounds = array<i64: 1, 32, 256>}]} {
    %c0_i32 = arith.constant 0 : i32
    %0 = arith.cmpi eq, %arg2, %c0_i32 : i32
    %1 = arith.extui %0 : i1 to i32
    %c0_i32_0 = arith.constant 0 : i32
    %2 = arith.cmpi ne, %1, %c0_i32_0 : i32
    scf.if %2 {
      %c0_22 = arith.constant 0 : index
      %c0_23 = arith.constant 0 : index
      %c0_24 = arith.constant 0 : index
      %40 = vector.load %arg4[%c0_22, %c0_23, %c0_24] : memref<1x32x256xbf16, #tpu.memory_space<vmem>>, vector<1x32x256xbf16>
      %41 = vector.shape_cast %40 : vector<1x32x256xbf16> to vector<32x256xbf16>
      %c0_25 = arith.constant 0 : index
      %c0_26 = arith.constant 0 : index
      %42 = vector.load %arg7[%c0_25, %c0_26] : memref<4x32xbf16, #tpu.memory_space<vmem>>, vector<4x32xbf16>
      %cst_27 = arith.constant dense<0.000000e+00> : vector<4x256xf32>
      %43 = tpu.matmul %42, %41, %cst_27 {dimension_numbers = #tpu.dot_dimension_numbers<[1], [0], [0], [1], [0, 0, 1, 1], [], []>} : vector<4x32xbf16>, vector<32x256xbf16>, vector<4x256xf32> -> vector<4x256xf32>
      %c0_28 = arith.constant 0 : index
      %c0_29 = arith.constant 0 : index
      %44 = vector.load %arg8[%c0_28, %c0_29] : memref<4x1xf32, #tpu.memory_space<vmem>>, vector<4x1xf32>
      %45 = vector.broadcast %44 : vector<4x1xf32> to vector<4x256xf32>
      %46 = arith.addf %43, %45 : vector<4x256xf32>
      %47 = arith.truncf %46 : vector<4x256xf32> to vector<4x256xbf16>
      %c0_30 = arith.constant 0 : index
      %c0_31 = arith.constant 0 : index
      %48 = vector.load %arg14[%c0_30, %c0_31] : memref<4x256xbf16, #tpu.memory_space<vmem>>, vector<4x256xbf16>
      tpu.vector_store %arg14[%c0_30, %c0_31], %47 {strides = array<i32>} : memref<4x256xbf16, #tpu.memory_space<vmem>>, vector<4x256xbf16>,
      %c0_32 = arith.constant 0 : index
      %c0_33 = arith.constant 0 : index
      %49 = vector.load %arg9[%c0_32, %c0_33] : memref<40x32xbf16, #tpu.memory_space<vmem>>, vector<40x32xbf16>
      %cst_34 = arith.constant dense<0.000000e+00> : vector<40x256xf32>
      %50 = tpu.matmul %49, %41, %cst_34 {dimension_numbers = #tpu.dot_dimension_numbers<[1], [0], [0], [1], [0, 0, 1, 1], [], []>} : vector<40x32xbf16>, vector<32x256xbf16>, vector<40x256xf32> -> vector<40x256xf32>
      %c0_35 = arith.constant 0 : index
      %c0_36 = arith.constant 0 : index
      %51 = vector.load %arg10[%c0_35, %c0_36] : memref<40x1xf32, #tpu.memory_space<vmem>>, vector<40x1xf32>
      %52 = vector.broadcast %51 : vector<40x1xf32> to vector<40x256xf32>
      %53 = arith.addf %50, %52 : vector<40x256xf32>
      %54 = arith.truncf %53 : vector<40x256xf32> to vector<40x256xbf16>
      %c0_37 = arith.constant 0 : index
      %c0_38 = arith.constant 0 : index
      %55 = vector.load %arg15[%c0_37, %c0_38] : memref<40x256xbf16, #tpu.memory_space<vmem>>, vector<40x256xbf16>
      tpu.vector_store %arg15[%c0_37, %c0_38], %54 {strides = array<i32>} : memref<40x256xbf16, #tpu.memory_space<vmem>>, vector<40x256xbf16>,
    } else {
    }
    %c0 = arith.constant 0 : index
    %c0_1 = arith.constant 0 : index
    %c0_2 = arith.constant 0 : index
    %3 = vector.load %arg3[%c0, %c0_1, %c0_2] : memref<1x32x256xf32, #tpu.memory_space<vmem>>, vector<1x32x256xf32>
    %4 = vector.shape_cast %3 : vector<1x32x256xf32> to vector<32x256xf32>
    %5 = tpu.transpose %4, [1, 0] : vector<32x256xf32> -> vector<256x32xf32>
    %6 = arith.truncf %5 : vector<256x32xf32> to vector<256x32xbf16>
    %c0_3 = arith.constant 0 : index
    %c0_4 = arith.constant 0 : index
    %7 = vector.load %arg5[%c0_3, %c0_4] : memref<32x4xbf16, #tpu.memory_space<vmem>>, vector<32x4xbf16>
    %cst = arith.constant dense<0.000000e+00> : vector<256x4xf32>
    %8 = tpu.matmul %6, %7, %cst {dimension_numbers = #tpu.dot_dimension_numbers<[1], [0], [0], [1], [0, 0, 1, 1], [], []>} : vector<256x32xbf16>, vector<32x4xbf16>, vector<256x4xf32> -> vector<256x4xf32>
    %c0_5 = arith.constant 0 : index
    %c0_6 = arith.constant 0 : index
    %9 = vector.load %arg6[%c0_5, %c0_6] : memref<1x4xf32, #tpu.memory_space<vmem>>, vector<1x4xf32>
    %10 = vector.broadcast %9 : vector<1x4xf32> to vector<256x4xf32>
    %11 = arith.addf %8, %10 : vector<256x4xf32>
    %12 = arith.truncf %11 : vector<256x4xf32> to vector<256x4xbf16>
    %c0_7 = arith.constant 0 : index
    %c0_8 = arith.constant 0 : index
    %13 = vector.load %arg14[%c0_7, %c0_8] : memref<4x256xbf16, #tpu.memory_space<vmem>>, vector<4x256xbf16>
    %cst_9 = arith.constant dense<0.000000e+00> : vector<256x256xf32>
    %14 = tpu.matmul %12, %13, %cst_9 {dimension_numbers = #tpu.dot_dimension_numbers<[1], [0], [0], [1], [0, 0, 1, 1], [], []>} : vector<256x4xbf16>, vector<4x256xbf16>, vector<256x256xf32> -> vector<256x256xf32>
    %cst_10 = arith.constant dense<0xFF800000> : vector<256xf32>
    %15 = vector.multi_reduction <maximumf>, %14, %cst_10 [1] : vector<256x256xf32> to vector<256xf32>
    %16 = vector.shape_cast %15 : vector<256xf32> to vector<256x1xf32>
    %17 = vector.broadcast %16 : vector<256x1xf32> to vector<256x256xf32>
    %18 = arith.subf %14, %17 : vector<256x256xf32>
    %19 = arith.truncf %18 : vector<256x256xf32> to vector<256x256xbf16>
    %20 = math.exp %19 : vector<256x256xbf16>
    %c0_11 = arith.constant 0 : index
    %c0_12 = arith.constant 0 : index
    %21 = vector.load %arg15[%c0_11, %c0_12] : memref<40x256xbf16, #tpu.memory_space<vmem>>, vector<40x256xbf16>
    %cst_13 = arith.constant dense<0.000000e+00> : vector<40x256xf32>
    %22 = tpu.matmul %21, %20, %cst_13 {dimension_numbers = #tpu.dot_dimension_numbers<[1], [1], [0], [0], [0, 0, 1, 0], [], []>} : vector<40x256xbf16>, vector<256x256xbf16>, vector<40x256xf32> -> vector<40x256xf32>
    %23 = vector.extract_strided_slice %22 {offsets = [32, 0], sizes = [1, 256], strides = [1, 1]} : vector<40x256xf32> to vector<1x256xf32>
    %24 = tpu.reciprocal %23 {approx = true} : vector<1x256xf32> -> vector<1x256xf32>
    %25 = vector.extract_strided_slice %22 {offsets = [0, 0], sizes = [32, 256], strides = [1, 1]} : vector<40x256xf32> to vector<32x256xf32>
    %26 = vector.broadcast %24 : vector<1x256xf32> to vector<32x256xf32>
    %27 = arith.mulf %25, %26 : vector<32x256xf32>
    %c0_14 = arith.constant 0 : index
    %c0_15 = arith.constant 0 : index
    %28 = vector.load %arg11[%c0_14, %c0_15] : memref<32x1xf32, #tpu.memory_space<vmem>>, vector<32x1xf32>
    %29 = vector.broadcast %28 : vector<32x1xf32> to vector<32x256xf32>
    %30 = arith.mulf %4, %29 : vector<32x256xf32>
    %31 = arith.addf %27, %30 : vector<32x256xf32>
    %c0_16 = arith.constant 0 : index
    %c0_17 = arith.constant 0 : index
    %32 = vector.load %arg12[%c0_16, %c0_17] : memref<32x1xf32, #tpu.memory_space<vmem>>, vector<32x1xf32>
    %33 = vector.broadcast %32 : vector<32x1xf32> to vector<32x256xf32>
    %34 = arith.addf %31, %33 : vector<32x256xf32>
    %cst_18 = arith.constant 0.000000e+00 : f32
    %35 = vector.broadcast %cst_18 : f32 to vector<32x256xf32>
    %36 = arith.maximumf %34, %35 : vector<32x256xf32>
    %c0_19 = arith.constant 0 : index
    %c0_20 = arith.constant 0 : index
    %c0_21 = arith.constant 0 : index
    %37 = vector.load %arg13[%c0_19, %c0_20, %c0_21] : memref<1x32x256xf32, #tpu.memory_space<vmem>>, vector<1x32x256xf32>
    %38 = vector.shape_cast %37 : vector<1x32x256xf32> to vector<32x256xf32>
    %39 = vector.shape_cast %36 : vector<32x256xf32> to vector<1x32x256xf32>
    tpu.vector_store %arg13[%c0_19, %c0_20, %c0_21], %39 {strides = array<i32>} : memref<1x32x256xf32, #tpu.memory_space<vmem>>, vector<1x32x256xf32>,
    return
  }
  func.func @transform_0(%arg0: i32, %arg1: i32, %arg2: i32) -> (i32, i32, i32) {
    %c1_i32 = arith.constant 1 : i32
    %0 = arith.muli %arg1, %c1_i32 : i32
    %1 = arith.addi %0, %arg2 : i32
    %c0_i32 = arith.constant 0 : i32
    %c0_i32_0 = arith.constant 0 : i32
    return %arg0, %c0_i32, %1 : i32, i32, i32
  }
  func.func @transform_1(%arg0: i32, %arg1: i32, %arg2: i32) -> (i32, i32, i32) {
    %c0_i32 = arith.constant 0 : i32
    %c0_i32_0 = arith.constant 0 : i32
    %c0_i32_1 = arith.constant 0 : i32
    return %arg0, %c0_i32, %c0_i32_0 : i32, i32, i32
  }
  func.func @transform_2(%arg0: i32, %arg1: i32, %arg2: i32) -> (i32, i32) {
    %c0_i32 = arith.constant 0 : i32
    %c0_i32_0 = arith.constant 0 : i32
    %c0_i32_1 = arith.constant 0 : i32
    return %c0_i32, %c0_i32_0 : i32, i32
  }
  func.func @transform_3(%arg0: i32, %arg1: i32, %arg2: i32) -> (i32, i32) {
    %c0_i32 = arith.constant 0 : i32
    %c0_i32_0 = arith.constant 0 : i32
    %c0_i32_1 = arith.constant 0 : i32
    return %c0_i32, %c0_i32_0 : i32, i32
  }
  func.func @transform_4(%arg0: i32, %arg1: i32, %arg2: i32) -> (i32, i32) {
    %c0_i32 = arith.constant 0 : i32
    %c0_i32_0 = arith.constant 0 : i32
    %c0_i32_1 = arith.constant 0 : i32
    return %c0_i32, %c0_i32_0 : i32, i32
  }
  func.func @transform_5(%arg0: i32, %arg1: i32, %arg2: i32) -> (i32, i32) {
    %c0_i32 = arith.constant 0 : i32
    %c0_i32_0 = arith.constant 0 : i32
    %c0_i32_1 = arith.constant 0 : i32
    return %c0_i32, %c0_i32_0 : i32, i32
  }
  func.func @transform_6(%arg0: i32, %arg1: i32, %arg2: i32) -> (i32, i32) {
    %c0_i32 = arith.constant 0 : i32
    %c0_i32_0 = arith.constant 0 : i32
    %c0_i32_1 = arith.constant 0 : i32
    return %c0_i32, %c0_i32_0 : i32, i32
  }
  func.func @transform_7(%arg0: i32, %arg1: i32, %arg2: i32) -> (i32, i32) {
    %c0_i32 = arith.constant 0 : i32
    %c0_i32_0 = arith.constant 0 : i32
    %c0_i32_1 = arith.constant 0 : i32
    return %c0_i32, %c0_i32_0 : i32, i32
  }
  func.func @transform_8(%arg0: i32, %arg1: i32, %arg2: i32) -> (i32, i32) {
    %c0_i32 = arith.constant 0 : i32
    %c0_i32_0 = arith.constant 0 : i32
    %c0_i32_1 = arith.constant 0 : i32
    return %c0_i32, %c0_i32_0 : i32, i32
  }
  func.func @transform_9(%arg0: i32, %arg1: i32, %arg2: i32) -> (i32, i32) {
    %c0_i32 = arith.constant 0 : i32
    %c0_i32_0 = arith.constant 0 : i32
    %c0_i32_1 = arith.constant 0 : i32
    return %c0_i32, %c0_i32_0 : i32, i32
  }
  func.func @transform_10(%arg0: i32, %arg1: i32, %arg2: i32) -> (i32, i32, i32) {
    %c1_i32 = arith.constant 1 : i32
    %0 = arith.muli %arg1, %c1_i32 : i32
    %1 = arith.addi %0, %arg2 : i32
    %c0_i32 = arith.constant 0 : i32
    %c0_i32_0 = arith.constant 0 : i32
    return %arg0, %c0_i32, %1 : i32, i32, i32
  }
}

</mosaic_0001>

<bundles_post_ra>
// kernel: tpu_custom_call.1
= control target key start
LH: loop header
LB: loop body
LE: loop exit
PB: predicated region body
PF: predicated region fallthrough
CT: control target
= control target key end

     0   :  { %15 = vsyncpa [#allocation5], 0  ;;  %s2990_s0 = inlined_call_operand.vmem [shape: f32[2,32,256], index: 0, kind: input, shape index: {}]   ;;  %s2991_s1 = inlined_call_operand.hbm [shape: bf16[2,32,256], index: 1, kind: input, shape index: {}]   ;;  %s2992_s2 = inlined_call_operand.vmem [shape: bf16[32,4], index: 2, kind: input, shape index: {}]   ;;  %s2993_s3 = inlined_call_operand.vmem [shape: f32[1,4], index: 3, kind: input, shape index: {}]   ;;  %s2994_s4 = inlined_call_operand.vmem [shape: bf16[4,32], index: 4, kind: input, shape index: {}]   ;;  %s2995_s5 = inlined_call_operand.vmem [shape: f32[4,1], index: 5, kind: input, shape index: {}]   ;;  %s2996_s6 = inlined_call_operand.vmem [shape: bf16[40,32], index: 6, kind: input, shape index: {}]   ;;  %s2997_s7 = inlined_call_operand.vmem [shape: f32[40,1], index: 7, kind: input, shape index: {}]   ;;  %s2998_s8 = inlined_call_operand.vmem [shape: f32[32,1], index: 8, kind: input, shape index: {}]   ;;  %s2999_s9 = inlined_call_operand.vmem [shape: f32[32,1], index: 9, kind: input, shape index: {}]   ;;  %s3000_s10 = inlined_call_operand.hbm [shape: f32[2,32,256], index: 10, kind: output, shape index: {}]  }
   0x1   :  { %17 = vsyncpa [#allocation5 + $0x1], 0 }
   0x2   :  { %18 = vsyncpa [#allocation6], 0 }
   0x3   :  { %20 = vsyncpa [#allocation6 + $0x1], 0  ;;  %s2377_s13 = smov 0   ;;  %s2379_s14 = smov 0  }
   0x4   :  { %s2381_s15 = smov 0   ;;  %s2383_s16 = smov 0  }
   0x5   :  { %s2385_s17 = smov 0   ;;  %s2387_s18 = smov 0  }
   0x6 LB: > { %3020 = sst [smem:[#allocation10_spill]] %s2293_s13  ;;  %s1902_s19 = sadd.s32 4294967295, %s2313_s18   ;;  %s2313_s18 = sphi %s2387_s18, %s26_s18   ;;  %s2309_s17 = sphi %s2385_s17, %s3085_s17   ;;  %s2305_s16 = sphi %s2383_s16, %s3084_s16   ;;  %s2301_s15 = sphi %s2381_s15, %s3088_s15   ;;  %s2297_s14 = sphi %s2379_s14, %s3087_s14   ;;  %s2293_s13 = sphi %s2377_s13, %s3086_s13  }
   0x7   : > { %3021 = sst [smem:[#allocation11_spill]] %s2309_s17  ;;  %s1903_s20 = sadd.s32 4294967294, %s2313_s18  }
   0x8   : > { %s45_s21 = sadd.s32 1, %s2309_s17  ;;  %s82_s22 = sadd.s32 1, %s2301_s15 }
   0x9   : > { %p47_p0 = scmp.ge.s32.totalorder %s45_s21, 2  ;;  %p89_p1 = scmp.ne.s32.totalorder %s2301_s15, %s2297_s14 }
   0xa   : > { %p90_p2 = scmp.eq.s32.totalorder %s2313_s18, 0  ;;  %p95_p3 = scmp.ne.s32.totalorder %s2297_s14, %s2293_s13 }
   0xb   : > { %s3090_s21 = smov (%p47_p0, %s45_s21), 0  ;;  %p96_p5 = scmp.eq.s32.totalorder %s1902_s19, 0 }
   0xc   : > { %3022 = sst [smem:[#allocation12_spill]] %s3090_s21  ;;  %p2418_p4 = por %p90_p2, %p89_p1 }
   0xd   : > { %s79_s24 = ssub.s32 %s2309_s17, %s3090_s21  ;;  %p291_p6 = scmp.eq.s32.totalorder %s1902_s19, 1 }
   0xe   : > { %p80_p7 = scmp.eq.s32.totalorder %s79_s24, 0  ;;  %p2424_p8 = por %p96_p5, %p95_p3 }
   0xf   : > { %p2428_p9 = por %p291_p6, %p89_p1  ;;  %p297_p10 = scmp.eq.s32.totalorder %s1903_s20, 1 }
  0x10   : > { %s2433_s27 = scalar_select %p80_p7, %s2301_s15, %s82_s22  }
  0x11   : > { %p2435_p11 = por %p297_p10, %p95_p3  ;;  %p2060_p13 = scmp.lt.s32.totalorder %s2313_s18, 2 }
  0x12   : > { %3026 = sst [smem:[#allocation13_spill]] %s2433_s27  ;;  %s356_s29 = sand.u32 1, %s2301_s15  }
  0x13   : > { %s1906_s30 = sshll.u32 %s356_s29, 5  ;;  %s1980_s11 = sshll.u32 %s2309_s17, 9 }
  0x14   : > { %s366_s24 = scalar_lea.hbm %s2991_s1, %s1980_s11  ;;  %s360_s21 = scalar_lea.vmem [#allocation4], %s1906_s30 }
  0x15   : > { %s367_s13 = sshll.u32 %s360_s21, 4  ;;  %p2448_p0 = pnand %p2060_p13, %p2418_p4  ;;  %s368_s13 = int_to_ptr.vmem [resolvable:$true] %s367_s13 }
  0x16   : > { %p1909_p1 = scmp.ge.s32.totalorder %s2313_s18, 1  ;;  %s357_s22 = scalar_lea.sflag [#allocation5], %s356_s29 }
  0x17   : > { %p2207_p2 = pneg %p2448_p0  ;;  %s2218_s27 = scalar_lea.vmem %s368_s13, 512 }
  0x18   : > { %p2219_p3 = scmp.ne.s32.totalorder %s368_s13, %s2218_s27  ;;  %s2315_s17 = smov [#allocation4]  }
  0x19   : > { %s2223_s12 = sshll.u32 %s2315_s17, 4  ;;  %s2224_s12 = int_to_ptr.vmem [resolvable:$false] %s2223_s12 }
  0x1a   : > { %p2221_p5 = pnand %p2219_p3, %p2207_p2  ;;  %s2225_s30 = scalar_lea.vmem %s2224_s12, 1024 }
  0x1b   : > { %p2226_p7 = scmp.lt.s32.totalorder %s368_s13, %s2224_s12  ;;  %p2227_p10 = scmp.lt.s32.totalorder %s2225_s30, %s2218_s27 }
  0x1c   : > { %p2222_p6 = pneg %p2221_p5 }
  0x1d   : > { %p2228_p12 = por %p2227_p10, %p2226_p7 }
  0x1f   : > { %p2229_p4 = pnand %p2228_p12, %p2222_p6 }
  0x21   : > { %2232 = shalt.err (!%p2229_p4)
}
  0x22   : > { %s2316_s21 = smov 128   ;;  %s2317_s23 = smov 8  }
  0x23   : > { %2055 = dma.hbm_to_vmem [thread:$0]  (!%p2448_p0), %s366_s24, 512, %s368_s13, %s357_s22, %s2316_s21, %s2316_s21, %s2317_s23  }
  0x24   : > { %p375_p13 = scmp.lt.s32.totalorder %s2313_s18, 3 }
  0x26   : > { %p376_p2 = pnand %p1909_p1, %p375_p13 }
  0x28   : > { %379 = sbr.rel (%p376_p2) target bundleno = 1194 (0x4aa), region = 60 }
  0x2d   : > { %s2461_s17 = sand.u32 1, %s2297_s14  }
  0x2e   : > { %s1910_s27 = sshll.u32 %s2461_s17, 5  ;;  %s382_s29 = scalar_lea.sflag [#allocation5], %s2461_s17 }
  0x2f   : > { %s385_s11 = scalar_lea.vmem [#allocation4], %s1910_s27 }
  0x30   : > { %2284 = dma.done.wait (%p2424_p8), %s382_s29, 512  }
  0x31   : > { %2286 = vsyncadd (%p2424_p8), %s382_s29, 4294966784  ;;  %p434_p12 = scmp.lt.s32.totalorder %s2305_s16, 1  ;;  %v2318_v0 = vmov 0   ;;  %v2118_v5 = vld [vmem:[%s385_s11 + $0x14] ss:$8 sps:$4 sm:$0xff]   ;;  %v2124_v11 = vld [vmem:[%s2992_s2 + $0x8] sm:$0xff]  }
  0x32   : > { %518 = vmatprep.mubr.bf16.mxu0 %v2318_v0  ;;  %630 = vmatprep.mubr.bf16.mxu1 %v2318_v0  ;;  %v2120_v6 = vld [vmem:[%s385_s11 + $0x10] ss:$8 sps:$4 sm:$0xff]   ;;  %v2121_v7 = vld [vmem:[%s385_s11 + $0x4] ss:$8 sps:$4 sm:$0xff]   ;;  %v2123_v10 = vld [vmem:[%s385_s11] ss:$8 sps:$4 sm:$0xff]  }
  0x33   : > { %s435_s13 = scalar_select %p434_p12, %s2305_s16, 1  ;;  %498 = vmatprep.subr.bf16.mxu0 %v2118_v5  ;;  %610 = vmatprep.subr.bf16.mxu1 %v2118_v5  ;;  %v455_v13 = vld [vmem:[%s2994_s4] sm:$0x3]  ;;  %vm482_vm0 = vcmask 261120   ;;  %v2127_v18 = vld [vmem:[%s2996_s6 + $0x8] sm:$0xff]   ;;  %vm1092_vm1 = vcmask 1041408  }
  0x34   : > { %499 = vmatpush1.bf16.msra.mxu0 %v2120_v6  ;;  %611 = vmatpush1.bf16.msra.mxu1 %v2120_v6  ;;  %v2125_v15 = vld [vmem:[%s2992_s2] sm:$0xff]   ;;  %v2128_v19 = vld [vmem:[%s2996_s6 + $0x10] ss:$0 sps:$4 sm:$0xff]   ;;  %vm1043_vm2 = vcmask 31744   ;;  %s1911_s29 = sshll.u32 %s2461_s17, 6  ;;  %s1780_s20 = scalar_lea.sflag [#allocation6], %s2461_s17 }
  0x35   : > { %s1981_s19 = sshll.u32 %s435_s13, 6  ;;  %500 = vmatprep.subr.bf16.mxu0 %v2121_v7  ;;  %612 = vmatprep.subr.bf16.mxu1 %v2121_v7  ;;  %v456_v16 = vld [vmem:[%s2995_s5] sm:$0xf]  ;;  %s431_s11 = scalar_lea.vmem [#allocation7], %s1911_s29 }
  0x36   : > { %s2476_s22 = scalar_lea.vmem %s2990_s0, %s1981_s19  ;;  %v2126_v17 = vld [vmem:[%s2996_s6] sm:$0xff]   ;;  %s1796_s13 = sshll.u32 %s431_s11, 4  ;;  %s2942_s13 = int_to_ptr.vmem [resolvable:$true] %s1796_s13 }
  0x37   : > { %v696_v1 = vld [vmem:[%s2476_s22] sm:$0xff]  ;;  %v697_v2 = vld [vmem:[%s2476_s22 + $0x8] sm:$0xff]  ;;  %v698_v3 = vld [vmem:[%s2476_s22 + $0x10] sm:$0xff]  ;;  %s2233_s25 = scalar_lea.vmem %s2942_s13, 1024  ;;  %s2319_s12 = smov [#allocation7]  }
  0x38   : > { %704 = vxpose.xlu0.b32.start [1/4] (short) %v696_v1, 128  ;;  %736 = vxpose.xlu1.b32.start [1/4] (short) %v697_v2, 128  ;;  %v699_v4 = vld [vmem:[%s2476_s22 + $0x18] sm:$0xff]  ;;  %v700_v8 = vld [vmem:[%s2476_s22 + $0x20] sm:$0xff]  ;;  %v701_v9 = vld [vmem:[%s2476_s22 + $0x28] sm:$0xff]  ;;  %p2234_p8 = scmp.ne.s32.totalorder %s2942_s13, %s2233_s25  ;;  %s2237_s30 = sshll.u32 %s2319_s12, 4  ;;  %s2238_s30 = int_to_ptr.vmem [resolvable:$false] %s2237_s30 }
  0x39   : > { %v702_v12 = vld [vmem:[%s2476_s22 + $0x30] sm:$0xff]  ;;  %501 = vmatpush1.bf16.msra.mxu0 %v2123_v10  ;;  %v703_v14 = vld [vmem:[%s2476_s22 + $0x38] sm:$0xff]  ;;  %613 = vmatpush1.bf16.msra.mxu1 %v2123_v10  ;;  %s2239_s21 = scalar_lea.vmem %s2238_s30, 2048  ;;  %p2240_p3 = scmp.lt.s32.totalorder %s2942_s13, %s2238_s30 }
  0x3a   : > { %2012 = vmatprep.subr.bf16.mxu0 %v2124_v11  ;;  %p2235_p0 = pnand %p2234_p8, %p2428_p9  ;;  %p2241_p5 = scmp.lt.s32.totalorder %s2239_s21, %s2233_s25 }
  0x3c   : > { %705 = vxpose.xlu0.b32.cont [2/4] (short) %v698_v3, 128  ;;  %737 = vxpose.xlu1.b32.cont [2/4] (short) %v699_v4, 128  ;;  %p2236_p1 = pneg %p2235_p0  ;;  %p2242_p6 = por %p2241_p5, %p2240_p3 }
  0x3d   : > { %1918 = vmatmul.mubr.msk.bf16.vlgmr.msra.gmra.mxu0 %vm482_vm0, %v455_v13  ;;  %1924 = vmatmul.mubr.msk.bf16.vlgmr.msra.gmra.mxu1 %vm482_vm0, %v2126_v17 }
  0x3e   : > { %2013 = vmatpush3.bf16.msra.mxu0 %v2124_v11  ;;  %640 = vmatprep.mubr.bf16.mxu1 %v2318_v0  ;;  %p2243_p7 = pnand %p2242_p6, %p2236_p1 }
  0x3f   : > { %2014 = vmatprep.subr.bf16.mxu0 %v2125_v15 }
  0x40   : > { %706 = vxpose.xlu0.b32.cont [3/4] (short) %v700_v8, 128  ;;  %738 = vxpose.xlu1.b32.cont [3/4] (short) %v701_v9, 128 }
  0x42   : > { %2015 = vmatpush3.bf16.msra.mxu0 %v2125_v15 }
  0x44   : > { %707 = vxpose.xlu0.b32.end [4/4] (short) %v702_v12, 128  ;;  %739 = vxpose.xlu1.b32.end [4/4] (short) %v703_v14, 128 }
  0x45   : > { %1925 = vmatmul.mubr.msk.bf16.gmra.mxu1 %vm482_vm0, %v2127_v18 }
  0x46   : > { %650 = vmatprep.mubr.bf16.mxu1 %v2318_v0 }
  0x4d   : > { %1926 = vmatmul.mubr.msk.bf16.gmra.mxu1 %vm482_vm0, %v2128_v19 }
  0x4e   : > { %1131 = vmatprep.mubr.bf16.mxu1 %v2318_v0 }
  0x62   : > { %2117 = vset.pattern.permute.xlu1 %v2318_v0 }
  0x6d   : > { %2116 = vset.pattern.permute.xlu0 %v2318_v0 }
  0x9d   : > { %459 = vperm.xlu0 %2116, %v456_v16  }
  0xb4   : > { %v720_v20 = vpop.trf.xlu0  ;;  %v752_v21 = vpop.trf.xlu1 }
  0xb8   : > { %v721_v22 = vpop.trf.xlu0  ;;  %v753_v24 = vpop.trf.xlu1 }
  0xb9   : > { %v768_v23 = vpack.c.bf16 %v721_v22, %v720_v20  ;;  %v776_v53 = vpack.c.bf16 %v753_v24, %v752_v21  ;;  %v2539_v21 = vld [vmem:[%s2993_s3] ss:$0 sm:$0xff] }
  0xbb   : > { %2016 = vmatprep.mubr.msk.bf16.mxu0 %vm482_vm0, %v768_v23 }
  0xbc   : > { %v722_v25 = vpop.trf.xlu0  ;;  %v754_v26 = vpop.trf.xlu1 }
  0xc0   : > { %v723_v27 = vpop.trf.xlu0  ;;  %v755_v30 = vpop.trf.xlu1 }
  0xc1   : > { %v769_v28 = vpack.c.bf16 %v723_v27, %v722_v25  ;;  %v777_v57 = vpack.c.bf16 %v755_v30, %v754_v26 }
  0xc3   : > { %2017 = vmatmul.mubr.msk.bf16.vlgmr.msra.gmra.mxu0 %vm482_vm0, %v769_v28 }
  0xc4   : > { %v724_v29 = vpop.trf.xlu0  ;;  %v756_v33 = vpop.trf.xlu1 }
  0xc8   : > { %v725_v31 = vpop.trf.xlu0  ;;  %v757_v36 = vpop.trf.xlu1 }
  0xc9   : > { %v770_v32 = vpack.c.bf16 %v725_v31, %v724_v29  ;;  %v778_v58 = vpack.c.bf16 %v757_v36, %v756_v33 }
  0xcb   : > { %2020 = vmatprep.mubr.msk.bf16.mxu0 %vm482_vm0, %v770_v32 }
  0xcc   : > { %v726_v34 = vpop.trf.xlu0  ;;  %v758_v39 = vpop.trf.xlu1 }
  0xd0   : > { %v727_v35 = vpop.trf.xlu0  ;;  %v759_v43 = vpop.trf.xlu1 }
  0xd1   : > { %v771_v37 = vpack.c.bf16 %v727_v35, %v726_v34  ;;  %v779_v60 = vpack.c.bf16 %v759_v43, %v758_v39 }
  0xd3   : > { %2021 = vmatmul.mubr.msk.bf16.gmra.mxu0 %vm482_vm0, %v771_v37 }
  0xd4   : > { %v728_v38 = vpop.trf.xlu0  ;;  %v760_v46 = vpop.trf.xlu1 }
  0xd8   : > { %v729_v40 = vpop.trf.xlu0  ;;  %v761_v49 = vpop.trf.xlu1 }
  0xd9   : > { %v772_v41 = vpack.c.bf16 %v729_v40, %v728_v38  ;;  %v780_v61 = vpack.c.bf16 %v761_v49, %v760_v46 }
  0xdb   : > { %2024 = vmatprep.mubr.msk.bf16.mxu0 %vm482_vm0, %v772_v41 }
  0xdc   : > { %v730_v42 = vpop.trf.xlu0  ;;  %v762_v52 = vpop.trf.xlu1 }
  0xe0   : > { %v731_v44 = vpop.trf.xlu0  ;;  %v763_v56 = vpop.trf.xlu1 }
  0xe1   : > { %v773_v45 = vpack.c.bf16 %v731_v44, %v730_v42  ;;  %v781_v3 = vpack.c.bf16 %v763_v56, %v762_v52 }
  0xe3   : > { %2025 = vmatmul.mubr.msk.bf16.gmra.mxu0 %vm482_vm0, %v773_v45 }
  0xe4   : > { %v732_v47 = vpop.trf.xlu0  ;;  %v764_v59 = vpop.trf.xlu1 }
  0xe8   : > { %v733_v48 = vpop.trf.xlu0  ;;  %v765_v62 = vpop.trf.xlu1 }
  0xe9   : > { %v774_v50 = vpack.c.bf16 %v733_v48, %v732_v47  ;;  %v782_v4 = vpack.c.bf16 %v765_v62, %v764_v59 }
  0xeb   : > { %2028 = vmatprep.mubr.msk.bf16.mxu0 %vm482_vm0, %v774_v50 }
  0xec   : > { %v734_v51 = vpop.trf.xlu0  ;;  %v766_v1 = vpop.trf.xlu1 }
  0xf0   : > { %v735_v54 = vpop.trf.xlu0  ;;  %v767_v7 = vpop.trf.xlu1 }
  0xf1   : > { %v775_v55 = vpack.c.bf16 %v735_v54, %v734_v51  ;;  %v783_v8 = vpack.c.bf16 %v767_v7, %v766_v1 }
  0xf3   : > { %2029 = vmatmul.mubr.msk.bf16.gmra.mxu0 %vm482_vm0, %v775_v55 }
  0xf4   : > { %2032 = vmatprep.mubr.msk.bf16.mxu0 %vm482_vm0, %v776_v53 }
  0xfb   : > { %2033 = vmatmul.mubr.msk.bf16.gmra.mxu0 %vm482_vm0, %v777_v57 }
  0xfc   : > { %2036 = vmatprep.mubr.msk.bf16.mxu0 %vm482_vm0, %v778_v58 }
  0xfd   : > { %v520_v63 = vpop.f32.mrf.mxu0  ;;  %v2532_v18 = vpop.f32.mrf.mxu1 }
  0xfe   : > { %3029 = vst [vmem:[#allocation14_spill] sm:$0xff] %v2532_v18 }
  0xff   : > { %v522_v2 = vpop.f32.mrf.mxu0  ;;  %v2534_v20 = vpop.f32.mrf.mxu1 }
 0x100   : > { %3030 = vst [vmem:[#allocation15_spill] sm:$0xff] %v2534_v20 }
 0x101   : > { %v524_v5 = vpop.f32.mrf.mxu0  ;;  %v2543_v25 = vpop.f32.mrf.mxu1 }
 0x102   : > { %3031 = vst [vmem:[#allocation16_spill] sm:$0xff] %v2543_v25 }
 0x103   : > { %2037 = vmatmul.mubr.msk.bf16.gmra.mxu0 %vm482_vm0, %v779_v60  ;;  %v525_v6 = vpop.f32.mrf.mxu0  ;;  %v2545_v27 = vpop.f32.mrf.mxu1 }
 0x104   : > { %2040 = vmatprep.mubr.msk.bf16.mxu0 %vm482_vm0, %v780_v61  ;;  %3032 = vst [vmem:[#allocation17_spill] sm:$0xff] %v2545_v27 }
 0x105   : > { %v2548_v28 = vpop.f32.mrf.mxu1 }
 0x106   : > { %3033 = vst [vmem:[#allocation18_spill] sm:$0xff] %v2548_v28 }
 0x107   : > { %v2552_v30 = vpop.f32.mrf.mxu1 }
 0x108   : > { %3034 = vst [vmem:[#allocation19_spill] sm:$0xff] %v2552_v30 }
 0x109   : > { %v2555_v32 = vpop.f32.mrf.mxu1 }
 0x10a   : > { %3035 = vst [vmem:[#allocation20_spill] sm:$0xff] %v2555_v32 }
 0x10b   : > { %2041 = vmatmul.mubr.msk.bf16.gmra.mxu0 %vm482_vm0, %v781_v3  ;;  %v2557_v35 = vpop.f32.mrf.mxu1 }
 0x10c   : > { %2044 = vmatprep.mubr.msk.bf16.mxu0 %vm482_vm0, %v782_v4  ;;  %3036 = vst [vmem:[#allocation21_spill] sm:$0xff] %v2557_v35 }
 0x10d   : > { %v2560_v37 = vpop.f32.mrf.mxu1 }
 0x10e   : > { %3037 = vst [vmem:[#allocation22_spill] sm:$0xff] %v2560_v37 }
 0x10f   : > { %v2563_v39 = vpop.f32.mrf.mxu1 }
 0x110   : > { %3038 = vst [vmem:[#allocation23_spill] sm:$0xff] %v2563_v39 }
 0x111   : > { %v656_v43 = vpop.f32.mrf.mxu1 }
 0x113   : > { %2045 = vmatmul.mubr.msk.bf16.gmra.mxu0 %vm482_vm0, %v783_v8  ;;  %v657_v45 = vpop.f32.mrf.mxu1 }
 0x118   : > { %v460_v9 = vpop.permute.xlu0 %459 }
 0x119   : > { %v521_v10 = vadd.f32 %v520_v63, %v460_v9  ;;  %v523_v11 = vadd.f32 %v522_v2, %v460_v9 }
 0x11b   : > { %v1919_v12 = vpack.c.bf16 %v523_v11, %v521_v10 }
 0x11d   : > { %1920 = vst.sshfl [vmem:[#allocation2] sm:$0x33 pattern:$0x76325410] %v1919_v12 }
 0x124   : > { %v1951_v13 = vld.sshfl [vmem:[#allocation2] sm:$0x33 pattern:$0x76325410] }
 0x125   : > { %v1042_v14 = vcombine.high %v1951_v13, %v1951_v13  ;;  %v1094_v15 = vsel %vm1092_vm1, %v1951_v13, 0 }
 0x127   : > { %1952 = vmatprep.subr.msk.bf16.mxu1 %vm1092_vm1, %v1042_v14 }
 0x128   : > { %1114 = vmatpush1.bf16.msra.mxu1 %v1094_v15 }
 0x183   : > { %v2018_v16 = vpop.f32.mrf.mxu0 }
 0x184   : > { %v899_v31 = vadd.f32 %v2018_v16, %v2539_v21 }
 0x185   : > { %v890_v17 = vpop.f32.mrf.mxu0 }
 0x186   : > { %v891_v23 = vadd.f32 %v2539_v21, %v890_v17 }
 0x187   : > { %v2019_v19 = vpop.f32.mrf.mxu0 }
 0x188   : > { %v902_v29 = vadd.f32 %v2019_v19, %v2539_v21 }
 0x189   : > { %v893_v22 = vpop.f32.mrf.mxu0 }
 0x18a   : > { %v894_v24 = vadd.f32 %v2539_v21, %v893_v22  ;;  %v1018_v34 = vpack.c.bf16 %v902_v29, %v899_v31 }
 0x18c   : > { %v1017_v26 = vpack.c.bf16 %v894_v24, %v891_v23 }
 0x18e   : > { %1953 = vmatmul.mubr.msk.bf16.vlgmr.msra.gmra.mxu1 %vm1043_vm2, %v1017_v26 }
 0x18f   : > { %1141 = vmatprep.mubr.bf16.mxu1 %v2318_v0 }
 0x193   : > { %v2022_v33 = vpop.f32.mrf.mxu0 }
 0x194   : > { %v915_v47 = vadd.f32 %v2022_v33, %v2539_v21 }
 0x195   : > { %v906_v36 = vpop.f32.mrf.mxu0 }
 0x196   : > { %1954 = vmatmul.mubr.msk.bf16.gmra.mxu1 %vm1043_vm2, %v1018_v34  ;;  %v907_v41 = vadd.f32 %v2539_v21, %v906_v36 }
 0x197   : > { %v2023_v38 = vpop.f32.mrf.mxu0  ;;  %1151 = vmatprep.mubr.bf16.mxu1 %v2318_v0 }
 0x198   : > { %v918_v46 = vadd.f32 %v2023_v38, %v2539_v21 }
 0x199   : > { %v909_v40 = vpop.f32.mrf.mxu0 }
 0x19a   : > { %v910_v42 = vadd.f32 %v2539_v21, %v909_v40  ;;  %v1020_v49 = vpack.c.bf16 %v918_v46, %v915_v47 }
 0x19c   : > { %v1019_v44 = vpack.c.bf16 %v910_v42, %v907_v41 }
 0x19e   : > { %1955 = vmatmul.mubr.msk.bf16.gmra.mxu1 %vm1043_vm2, %v1019_v44 }
 0x19f   : > { %1161 = vmatprep.mubr.bf16.mxu1 %v2318_v0 }
 0x1a3   : > { %v2026_v48 = vpop.f32.mrf.mxu0 }
 0x1a4   : > { %v931_v57 = vadd.f32 %v2026_v48, %v2539_v21 }
 0x1a5   : > { %v922_v50 = vpop.f32.mrf.mxu0 }
 0x1a6   : > { %1956 = vmatmul.mubr.msk.bf16.gmra.mxu1 %vm1043_vm2, %v1020_v49  ;;  %v923_v53 = vadd.f32 %v2539_v21, %v922_v50 }
 0x1a7   : > { %v2027_v51 = vpop.f32.mrf.mxu0  ;;  %1171 = vmatprep.mubr.bf16.mxu1 %v2318_v0 }
 0x1a8   : > { %v934_v56 = vadd.f32 %v2027_v51, %v2539_v21 }
 0x1a9   : > { %v925_v52 = vpop.f32.mrf.mxu0 }
 0x1aa   : > { %v926_v54 = vadd.f32 %v2539_v21, %v925_v52  ;;  %v1022_v59 = vpack.c.bf16 %v934_v56, %v931_v57 }
 0x1ac   : > { %v1021_v55 = vpack.c.bf16 %v926_v54, %v923_v53 }
 0x1ae   : > { %1957 = vmatmul.mubr.msk.bf16.gmra.mxu1 %vm1043_vm2, %v1021_v55 }
 0x1af   : > { %1181 = vmatprep.mubr.bf16.mxu1 %v2318_v0 }
 0x1b3   : > { %v2030_v58 = vpop.f32.mrf.mxu0 }
 0x1b4   : > { %v947_v7 = vadd.f32 %v2030_v58, %v2539_v21 }
 0x1b5   : > { %v938_v60 = vpop.f32.mrf.mxu0 }
 0x1b6   : > { %1958 = vmatmul.mubr.msk.bf16.gmra.mxu1 %vm1043_vm2, %v1022_v59  ;;  %v939_v63 = vadd.f32 %v2539_v21, %v938_v60 }
 0x1b7   : > { %v2031_v61 = vpop.f32.mrf.mxu0  ;;  %1191 = vmatprep.mubr.bf16.mxu1 %v2318_v0 }
 0x1b8   : > { %v950_v5 = vadd.f32 %v2031_v61, %v2539_v21 }
 0x1b9   : > { %v941_v62 = vpop.f32.mrf.mxu0 }
 0x1ba   : > { %v942_v1 = vadd.f32 %v2539_v21, %v941_v62  ;;  %v1024_v8 = vpack.c.bf16 %v950_v5, %v947_v7 }
 0x1bb   : > { %v2034_v2 = vpop.f32.mrf.mxu0 }
 0x1bc   : > { %v1023_v3 = vpack.c.bf16 %v942_v1, %v939_v63  ;;  %v963_v15 = vadd.f32 %v2034_v2, %v2539_v21 }
 0x1bd   : > { %v954_v4 = vpop.f32.mrf.mxu0 }
 0x1be   : > { %1959 = vmatmul.mubr.msk.bf16.gmra.mxu1 %vm1043_vm2, %v1023_v3  ;;  %v955_v12 = vadd.f32 %v2539_v21, %v954_v4 }
 0x1bf   : > { %1201 = vmatprep.mubr.bf16.mxu1 %v2318_v0  ;;  %v2035_v6 = vpop.f32.mrf.mxu0 }
 0x1c0   : > { %v966_v16 = vadd.f32 %v2035_v6, %v2539_v21 }
 0x1c1   : > { %v957_v9 = vpop.f32.mrf.mxu0 }
 0x1c2   : > { %v958_v10 = vadd.f32 %v2539_v21, %v957_v9  ;;  %v1026_v19 = vpack.c.bf16 %v966_v16, %v963_v15 }
 0x1c3   : > { %v2038_v11 = vpop.f32.mrf.mxu0 }
 0x1c4   : > { %v1025_v13 = vpack.c.bf16 %v958_v10, %v955_v12  ;;  %v979_v33 = vadd.f32 %v2038_v11, %v2539_v21 }
 0x1c5   : > { %v970_v14 = vpop.f32.mrf.mxu0 }
 0x1c6   : > { %1960 = vmatmul.mubr.msk.bf16.gmra.mxu1 %vm1043_vm2, %v1024_v8  ;;  %v971_v23 = vadd.f32 %v2539_v21, %v970_v14 }
 0x1c7   : > { %1211 = vmatprep.mubr.bf16.mxu1 %v2318_v0  ;;  %v2039_v17 = vpop.f32.mrf.mxu0 }
 0x1c8   : > { %v982_v34 = vadd.f32 %v2039_v17, %v2539_v21 }
 0x1c9   : > { %v973_v22 = vpop.f32.mrf.mxu0 }
 0x1ca   : > { %v974_v24 = vadd.f32 %v2539_v21, %v973_v22  ;;  %v1028_v38 = vpack.c.bf16 %v982_v34, %v979_v33 }
 0x1cb   : > { %v2042_v26 = vpop.f32.mrf.mxu0 }
 0x1cc   : > { %v1027_v29 = vpack.c.bf16 %v974_v24, %v971_v23  ;;  %v995_v46 = vadd.f32 %v2042_v26, %v2539_v21 }
 0x1cd   : > { %v986_v31 = vpop.f32.mrf.mxu0 }
 0x1ce   : > { %1961 = vmatmul.mubr.msk.bf16.gmra.mxu1 %vm1043_vm2, %v1025_v13  ;;  %v987_v41 = vadd.f32 %v2539_v21, %v986_v31 }
 0x1cf   : > { %1221 = vmatprep.mubr.bf16.mxu1 %v2318_v0  ;;  %v2043_v36 = vpop.f32.mrf.mxu0 }
 0x1d0   : > { %v998_v47 = vadd.f32 %v2043_v36, %v2539_v21 }
 0x1d1   : > { %v989_v40 = vpop.f32.mrf.mxu0 }
 0x1d2   : > { %v990_v42 = vadd.f32 %v2539_v21, %v989_v40  ;;  %v1030_v49 = vpack.c.bf16 %v998_v47, %v995_v46 }
 0x1d3   : > { %v2046_v43 = vpop.f32.mrf.mxu0 }
 0x1d4   : > { %v1029_v44 = vpack.c.bf16 %v990_v42, %v987_v41  ;;  %v1011_v54 = vadd.f32 %v2046_v43, %v2539_v21 }
 0x1d5   : > { %v1002_v45 = vpop.f32.mrf.mxu0 }
 0x1d6   : > { %1962 = vmatmul.mubr.msk.bf16.gmra.mxu1 %vm1043_vm2, %v1026_v19  ;;  %v1003_v51 = vadd.f32 %v2539_v21, %v1002_v45 }
 0x1d7   : > { %1231 = vmatprep.mubr.bf16.mxu1 %v2318_v0  ;;  %v2047_v48 = vpop.f32.mrf.mxu0 }
 0x1d8   : > { %v1014_v55 = vadd.f32 %v2047_v48, %v2539_v21 }
 0x1d9   : > { %v1005_v50 = vpop.f32.mrf.mxu0 }
 0x1da   : > { %v1006_v52 = vadd.f32 %v2539_v21, %v1005_v50  ;;  %v1032_v56 = vpack.c.bf16 %v1014_v55, %v1011_v54 }
 0x1dc   : > { %v1031_v53 = vpack.c.bf16 %v1006_v52, %v1003_v51 }
 0x1de   : > { %1963 = vmatmul.mubr.msk.bf16.gmra.mxu1 %vm1043_vm2, %v1027_v29 }
 0x1df   : > { %1241 = vmatprep.mubr.bf16.mxu1 %v2318_v0 }
 0x1e6   : > { %1964 = vmatmul.mubr.msk.bf16.gmra.mxu1 %vm1043_vm2, %v1028_v38 }
 0x1e7   : > { %1251 = vmatprep.mubr.bf16.mxu1 %v2318_v0 }
 0x1ee   : > { %1965 = vmatmul.mubr.msk.bf16.gmra.mxu1 %vm1043_vm2, %v1029_v44 }
 0x1ef   : > { %1261 = vmatprep.mubr.bf16.mxu1 %v2318_v0 }
 0x1f6   : > { %1966 = vmatmul.mubr.msk.bf16.gmra.mxu1 %vm1043_vm2, %v1030_v49 }
 0x1f7   : > { %1271 = vmatprep.mubr.bf16.mxu1 %v2318_v0 }
 0x1fe   : > { %1967 = vmatmul.mubr.msk.bf16.gmra.mxu1 %vm1043_vm2, %v1031_v53 }
 0x1ff   : > { %1281 = vmatprep.mubr.bf16.mxu1 %v2318_v0 }
 0x206   : > { %1968 = vmatmul.mubr.msk.bf16.gmra.mxu1 %vm1043_vm2, %v1032_v56 }
 0x24e   : > { %v2620_v57 = vpop.f32.mrf.mxu1 }
 0x24f   : > { %3039 = vst [vmem:[#allocation24_spill] sm:$0xff] %v2620_v57 }
 0x250   : > { %v2622_v58 = vpop.f32.mrf.mxu1 }
 0x251   : > { %3040 = vst [vmem:[#allocation25_spill] sm:$0xff] %v2622_v58 }
 0x252   : > { %v2624_v59 = vpop.f32.mrf.mxu1 }
 0x253   : > { %3041 = vst [vmem:[#allocation26_spill] sm:$0xff] %v2624_v59 }
 0x254   : > { %v2626_v60 = vpop.f32.mrf.mxu1 }
 0x255   : > { %3042 = vst [vmem:[#allocation27_spill] sm:$0xff] %v2626_v60  ;;  %v1295_v38 = vmax.f32 %v2624_v59, %v2626_v60 }
 0x256   : > { %v2628_v61 = vpop.f32.mrf.mxu1 }
 0x258   : > { %v2630_v62 = vpop.f32.mrf.mxu1 }
 0x25a   : > { %v2632_v0 = vpop.f32.mrf.mxu1 }
 0x25b   : > { %3043 = vst [vmem:[#allocation28_spill] sm:$0xff] %v2632_v0 }
 0x25c   : > { %v2634_v63 = vpop.f32.mrf.mxu1 }
 0x25d   : > { %v1301_v31 = vmax.f32 %v2632_v0, %v2634_v63 }
 0x25e   : > { %v2636_v21 = vpop.f32.mrf.mxu1 }
 0x260   : > { %v2638_v1 = vpop.f32.mrf.mxu1 }
 0x262   : > { %v2640_v2 = vpop.f32.mrf.mxu1 }
 0x264   : > { %v2642_v3 = vpop.f32.mrf.mxu1 }
 0x265   : > { %v1307_v24 = vmax.f32 %v2640_v2, %v2642_v3 }
 0x266   : > { %v2644_v4 = vpop.f32.mrf.mxu1 }
 0x268   : > { %v2646_v5 = vpop.f32.mrf.mxu1 }
 0x26a   : > { %v2648_v6 = vpop.f32.mrf.mxu1 }
 0x26c   : > { %v2650_v7 = vpop.f32.mrf.mxu1 }
 0x26e   : > { %v2652_v8 = vpop.f32.mrf.mxu1 }
 0x270   : > { %v2654_v9 = vpop.f32.mrf.mxu1 }
 0x271   : > { %v1316_v52 = vmax.f32 %v2652_v8, %v2654_v9 }
 0x272   : > { %v2656_v10 = vpop.f32.mrf.mxu1 }
 0x274   : > { %v2658_v11 = vpop.f32.mrf.mxu1 }
 0x275   : > { %v1319_v55 = vmax.f32 %v2656_v10, %v2658_v11 }
 0x276   : > { %v2660_v12 = vpop.f32.mrf.mxu1 }
 0x278   : > { %v2662_v13 = vpop.f32.mrf.mxu1 }
 0x279   : > { %v1322_v46 = vmax.f32 %v2660_v12, %v2662_v13 }
 0x27a   : > { %v2664_v14 = vpop.f32.mrf.mxu1 }
 0x27c   : > { %v2666_v15 = vpop.f32.mrf.mxu1 }
 0x27d   : > { %v1325_v49 = vmax.f32 %v2664_v14, %v2666_v15 }
 0x27e   : > { %v2668_v16 = vpop.f32.mrf.mxu1 }
 0x280   : > { %v2670_v17 = vpop.f32.mrf.mxu1 }
 0x281   : > { %v1328_v19 = vmax.f32 %v2668_v16, %v2670_v17 }
 0x282   : > { %v2674_v22 = vpop.f32.mrf.mxu1 }
 0x283   : > { %1329 = vmax.xlane.f32.xlu0 %v1328_v19 }
 0x284   : > { %v2676_v23 = vpop.f32.mrf.mxu1 }
 0x285   : > { %v1331_v43 = vmax.f32 %v2674_v22, %v2676_v23 }
 0x286   : > { %v2680_v26 = vpop.f32.mrf.mxu1 }
 0x287   : > { %1308 = vmax.xlane.f32.xlu0 %v1307_v24  ;;  %v1310_v24 = vmax.f32 %v2644_v4, %v2646_v5 }
 0x288   : > { %v2682_v29 = vpop.f32.mrf.mxu1 }
 0x289   : > { %v1334_v33 = vmax.f32 %v2680_v26, %v2682_v29 }
 0x28a   : > { %v2688_v34 = vpop.f32.mrf.mxu1 }
 0x28b   : > { %1302 = vmax.xlane.f32.xlu0 %v1301_v31  ;;  %1335 = vmax.xlane.f32.xlu1 %v1334_v33 }
 0x28c   : > { %v2690_v36 = vpop.f32.mrf.mxu1 }
 0x28d   : > { %v1337_v40 = vmax.f32 %v2688_v34, %v2690_v36 }
 0x28e   : > { %v2696_v41 = vpop.f32.mrf.mxu1 }
 0x28f   : > { %3044 = vst [vmem:[#allocation29_spill] sm:$0xff] %v2696_v41  ;;  %1296 = vmax.xlane.f32.xlu0 %v1295_v38  ;;  %1338 = vmax.xlane.f32.xlu1 %v1337_v40  ;;  %v1313_v38 = vmax.f32 %v2648_v6, %v2650_v7 }
 0x290   : > { %v2698_v42 = vpop.f32.mrf.mxu1 }
 0x291   : > { %3045 = vst [vmem:[#allocation30_spill] sm:$0xff] %v2698_v42 }
 0x292   : > { %v2702_v44 = vpop.f32.mrf.mxu1 }
 0x293   : > { %3046 = vst [vmem:[#allocation31_spill] sm:$0xff] %v2702_v44  ;;  %1332 = vmax.xlane.f32.xlu1 %v1331_v43 }
 0x294   : > { %v2704_v45 = vpop.f32.mrf.mxu1 }
 0x295   : > { %3047 = vst [vmem:[#allocation32_spill] sm:$0xff] %v2704_v45 }
 0x296   : > { %v2708_v47 = vpop.f32.mrf.mxu1 }
 0x297   : > { %3048 = vst [vmem:[#allocation33_spill] sm:$0xff] %v2708_v47  ;;  %1323 = vmax.xlane.f32.xlu1 %v1322_v46  ;;  %v1304_v46 = vmax.f32 %v2636_v21, %v2638_v1 }
 0x298   : > { %v2710_v48 = vpop.f32.mrf.mxu1 }
 0x299   : > { %3049 = vst [vmem:[#allocation34_spill] sm:$0xff] %v2710_v48 }
 0x29a   : > { %v2714_v50 = vpop.f32.mrf.mxu1 }
 0x29b   : > { %3050 = vst [vmem:[#allocation35_spill] sm:$0xff] %v2714_v50  ;;  %1326 = vmax.xlane.f32.xlu1 %v1325_v49 }
 0x29c   : > { %v2716_v51 = vpop.f32.mrf.mxu1 }
 0x29d   : > { %3051 = vst [vmem:[#allocation36_spill] sm:$0xff] %v2716_v51 }
 0x29e   : > { %v2720_v53 = vpop.f32.mrf.mxu1 }
 0x29f   : > { %3052 = vst [vmem:[#allocation37_spill] sm:$0xff] %v2720_v53  ;;  %1317 = vmax.xlane.f32.xlu1 %v1316_v52 }
 0x2a0   : > { %v2722_v54 = vpop.f32.mrf.mxu1 }
 0x2a2   : > { %v2726_v56 = vpop.f32.mrf.mxu1 }
 0x2a3   : > { %3053 = vst [vmem:[#allocation38_spill] sm:$0xff] %v2726_v56  ;;  %1320 = vmax.xlane.f32.xlu1 %v1319_v55  ;;  %v1298_v55 = vmax.f32 %v2628_v61, %v2630_v62 }
 0x2a4   : > { %v2728_v19 = vpop.f32.mrf.mxu1 }
 0x2a6   : > { %v2732_v31 = vpop.f32.mrf.mxu1 }
 0x2a7   : > { %1311 = vmax.xlane.f32.xlu1 %v1310_v24 }
 0x2a8   : > { %v2734_v33 = vpop.f32.mrf.mxu1 }
 0x2aa   : > { %v2738_v40 = vpop.f32.mrf.mxu1 }
 0x2ab   : > { %1314 = vmax.xlane.f32.xlu1 %v1313_v38  ;;  %v1292_v38 = vmax.f32 %v2620_v57, %v2622_v58 }
 0x2ac   : > { %v2740_v43 = vpop.f32.mrf.mxu1 }
 0x2ae   : > { %v2744_v49 = vpop.f32.mrf.mxu1 }
 0x2af   : > { %1305 = vmax.xlane.f32.xlu1 %v1304_v46 }
 0x2b0   : > { %v2746_v52 = vpop.f32.mrf.mxu1 }
 0x2b2   : > { %v2750_v24 = vpop.f32.mrf.mxu1 }
 0x2b3   : > { %1299 = vmax.xlane.f32.xlu1 %v1298_v55 }
 0x2b4   : > { %v2752_v37 = vpop.f32.mrf.mxu1 }
 0x2b6   : > { %v2756_v28 = vpop.f32.mrf.mxu1 }
 0x2b7   : > { %1293 = vmax.xlane.f32.xlu1 %v1292_v38 }
 0x2b8   : > { %v2758_v39 = vpop.f32.mrf.mxu1 }
 0x2b9   : > { %v1370_v0 = vmax.f32 %v2756_v28, %v2758_v39 }
 0x2ba   : > { %v2760_v32 = vpop.f32.mrf.mxu1 }
 0x2bc   : > { %v2762_v46 = vpop.f32.mrf.mxu1 }
 0x2be   : > { %v2764_v30 = vpop.f32.mrf.mxu1 }
 0x2c0   : > { %v2766_v18 = vpop.f32.mrf.mxu1 }
 0x2c1   : > { %v1376_v60 = vmax.f32 %v2764_v30, %v2766_v18 }
 0x2c2   : > { %v2768_v35 = vpop.f32.mrf.mxu1 }
 0x2c4   : > { %v2770_v55 = vpop.f32.mrf.mxu1 }
 0x2c5   : > { %v1379_v58 = vmax.f32 %v2768_v35, %v2770_v55 }
 0x2c6   : > { %v2772_v25 = vpop.f32.mrf.mxu1 }
 0x2c8   : > { %v2774_v27 = vpop.f32.mrf.mxu1 }
 0x2c9   : > { %3054 = vst [vmem:[#allocation39_spill] sm:$0xff] %v2774_v27  ;;  %v1382_v38 = vmax.f32 %v2772_v25, %v2774_v27  ;;  %v1373_v27 = vmax.f32 %v2760_v32, %v2762_v46 }
 0x2ca   : > { %v2778_v20 = vpop.f32.mrf.mxu1 }
 0x2cb   : > { %1383 = vmax.xlane.f32.xlu1 %v1382_v38  ;;  %v1364_v38 = vmax.f32 %v2744_v49, %v2746_v52 }
 0x2cc   : > { %v2780_v59 = vpop.f32.mrf.mxu1 }
 0x2cd   : > { %v1385_v57 = vmax.f32 %v2778_v20, %v2780_v59 }
 0x2cf   : > { %1377 = vmax.xlane.f32.xlu1 %v1376_v60  ;;  %1386 = vmax.xlane.f32.xlu0 %v1385_v57  ;;  %v1358_v60 = vmax.f32 %v2732_v31, %v2734_v33  ;;  %v1367_v57 = vmax.f32 %v2750_v24, %v2752_v37 }
 0x2d3   : > { %1371 = vmax.xlane.f32.xlu1 %v1370_v0  ;;  %1380 = vmax.xlane.f32.xlu0 %v1379_v58  ;;  %v1352_v0 = vmax.f32 %v2720_v53, %v2722_v54  ;;  %v1361_v58 = vmax.f32 %v2738_v40, %v2740_v43 }
 0x2d7   : > { %1365 = vmax.xlane.f32.xlu1 %v1364_v38  ;;  %1374 = vmax.xlane.f32.xlu0 %v1373_v27  ;;  %v1346_v38 = vmax.f32 %v2708_v47, %v2710_v48  ;;  %v1355_v27 = vmax.f32 %v2726_v56, %v2728_v19 }
 0x2db   : > { %1359 = vmax.xlane.f32.xlu1 %v1358_v60  ;;  %1368 = vmax.xlane.f32.xlu0 %v1367_v57  ;;  %v1340_v60 = vmax.f32 %v2696_v41, %v2698_v42  ;;  %v1349_v57 = vmax.f32 %v2714_v50, %v2716_v51 }
 0x2df   : > { %1353 = vmax.xlane.f32.xlu1 %v1352_v0  ;;  %1362 = vmax.xlane.f32.xlu0 %v1361_v58  ;;  %v1343_v0 = vmax.f32 %v2702_v44, %v2704_v45  ;;  %v546_v58 = vld [vmem:[%s2997_s7] sm:$0xff] }
 0x2e3   : > { %1347 = vmax.xlane.f32.xlu1 %v1346_v38  ;;  %1356 = vmax.xlane.f32.xlu0 %v1355_v27  ;;  %v548_v38 = vld [vmem:[%s2997_s7 + $0x10] sm:$0xff]  ;;  %v549_v27 = vld [vmem:[%s2997_s7 + $0x18] sm:$0xff] }
 0x2e7   : > { %1341 = vmax.xlane.f32.xlu1 %v1340_v60  ;;  %1350 = vmax.xlane.f32.xlu0 %v1349_v57  ;;  %v547_v60 = vld [vmem:[%s2997_s7 + $0x8] sm:$0xff]  ;;  %v1691_v57 = vld [vmem:[%s2998_s8] sm:$0xff] }
 0x2eb   : > { %1344 = vmax.xlane.f32.xlu0 %v1343_v0  ;;  %v550_v0 = vld [vmem:[%s2997_s7 + $0x20] sm:$0xff] }
 0x2f8   : > { %553 = vperm.xlu1 %2117, %v546_v58   ;;  %v1693_v58 = vld [vmem:[%s2998_s8 + $0x10] sm:$0xff] }
 0x2fc   : > { %563 = vperm.xlu1 %2117, %v548_v38   ;;  %v1692_v38 = vld [vmem:[%s2998_s8 + $0x8] sm:$0xff] }
 0x300   : > { %568 = vperm.xlu1 %2117, %v549_v27   ;;  %v1731_v27 = vld [vmem:[%s2999_s9] sm:$0xff] }
 0x301   : > { %558 = vperm.xlu0 %2116, %v547_v60   ;;  %v1694_v60 = vld [vmem:[%s2998_s8 + $0x18] sm:$0xff] }
 0x304   : > { %1697 = vperm.xlu1 %2117, %v1691_v57   ;;  %v1733_v57 = vld [vmem:[%s2999_s9 + $0x10] sm:$0xff] }
 0x305   : > { %573 = vperm.xlu0 %2116, %v550_v0   ;;  %v1732_v0 = vld [vmem:[%s2999_s9 + $0x8] sm:$0xff] }
 0x308   : > { %1707 = vperm.xlu1 %2117, %v1693_v58   ;;  %v1734_v58 = vld [vmem:[%s2999_s9 + $0x18] sm:$0xff] }
 0x309   : > { %1702 = vperm.xlu0 %2116, %v1692_v38  }
 0x30c   : > { %1737 = vperm.xlu1 %2117, %v1731_v27   ;;  %v1330_v44 = vpop.xlane.xlu0 %1329 }
 0x30d   : > { %1712 = vperm.xlu0 %2116, %v1694_v60   ;;  %v1412_v56 = vsub.f32 %v2668_v16, %v1330_v44 }
 0x310   : > { %1747 = vperm.xlu1 %2117, %v1733_v57   ;;  %v1413_v57 = vsub.f32 %v2670_v17, %v1330_v44 }
 0x311   : > { %1742 = vperm.xlu0 %2116, %v1732_v0  }
 0x314   : > { %v1336_v38 = vpop.xlane.xlu1 %1335 }
 0x315   : > { %1752 = vperm.xlu0 %2116, %v1734_v58   ;;  %v1416_v27 = vsub.f32 %v2680_v26, %v1336_v38  ;;  %v1417_v60 = vsub.f32 %v2682_v29, %v1336_v38 }
 0x318   : > { %v1339_v41 = vpop.xlane.xlu1 %1338 }
 0x319   : > { %v1418_v42 = vsub.f32 %v2688_v34, %v1339_v41  ;;  %v1419_v47 = vsub.f32 %v2690_v36, %v1339_v41 }
 0x31b   : > { %v1466_v45 = vpack.c.bf16 %v1418_v42, %v1416_v27  ;;  %v1467_v50 = vpack.c.bf16 %v1419_v47, %v1417_v60 }
 0x31c   : > { %v1333_v0 = vpop.xlane.xlu1 %1332 }
 0x31d   : > { %v1527_v48 = vmul.bf16 1069105081, %v1466_v45  ;;  %v1530_v53 = vmul.bf16 1069105081, %v1467_v50  ;;  %v1414_v51 = vsub.f32 %v2674_v22, %v1333_v0  ;;  %v1415_v58 = vsub.f32 %v2676_v23, %v1333_v0 }
 0x31f   : > { %2129 = vpow.bf16 %v1527_v48  ;;  %v1465_v26 = vpack.c.bf16 %v1415_v58, %v1413_v57  ;;  %v1464_v34 = vpack.c.bf16 %v1414_v51, %v1412_v56 }
 0x320   : > { %2131 = vpow.bf16 %v1530_v53  ;;  %v1324_v29 = vpop.xlane.xlu1 %1323 }
 0x321   : > { %v1524_v38 = vmul.bf16 1069105081, %v1465_v26  ;;  %v1521_v41 = vmul.bf16 1069105081, %v1464_v34  ;;  %v1409_v17 = vsub.f32 %v2662_v13, %v1324_v29  ;;  %v1408_v22 = vsub.f32 %v2660_v12, %v1324_v29  ;;  %v1309_v26 = vpop.xlane.xlu0 %1308 }
 0x323   : > { %2133 = vpow.bf16 %v1524_v38 }
 0x324   : > { %v1327_v36 = vpop.xlane.xlu1 %1326  ;;  %2135 = vpow.bf16 %v1521_v41 }
 0x325   : > { %v1410_v42 = vsub.f32 %v2664_v14, %v1327_v36  ;;  %v1411_v45 = vsub.f32 %v2666_v15, %v1327_v36  ;;  %v1399_v36 = vsub.f32 %v2642_v3, %v1309_v26 }
 0x327   : > { %v1463_v23 = vpack.c.bf16 %v1411_v45, %v1409_v17  ;;  %v1462_v16 = vpack.c.bf16 %v1410_v42, %v1408_v22 }
 0x328   : > { %v1318_v47 = vpop.xlane.xlu1 %1317 }
 0x329   : > { %v1518_v44 = vmul.bf16 1069105081, %v1463_v23  ;;  %v1515_v51 = vmul.bf16 1069105081, %v1462_v16  ;;  %v1405_v53 = vsub.f32 %v2654_v9, %v1318_v47  ;;  %v1404_v15 = vsub.f32 %v2652_v8, %v1318_v47 }
 0x32b   : > { %2137 = vpow.bf16 %v1518_v44  ;;  %v1398_v44 = vsub.f32 %v2640_v2, %v1309_v26  ;;  %v3058_v26 = vld [vmem:[#allocation24_spill] sm:$0xff] }
 0x32c   : > { %v1321_v48 = vpop.xlane.xlu1 %1320  ;;  %2139 = vpow.bf16 %v1515_v51 }
 0x32d   : > { %v2130_v50 = vpop.eup %2129  ;;  %v1406_v56 = vsub.f32 %v2656_v10, %v1321_v48  ;;  %v1407_v13 = vsub.f32 %v2658_v11, %v1321_v48 }
 0x32e   : > { %v2132_v14 = vpop.eup %2131 }
 0x32f   : > { %v1461_v27 = vpack.c.bf16 %v1407_v13, %v1405_v53  ;;  %1612 = vmatprep.subr.bf16.mxu0 %v2132_v14  ;;  %v1460_v60 = vpack.c.bf16 %v1406_v56, %v1404_v15  ;;  %v3055_v15 = vld [vmem:[#allocation25_spill] sm:$0xff] }
 0x330   : > { %1613 = vmatpush1.bf16.xpose.msra.mxu0 %v2130_v50  ;;  %v1312_v12 = vpop.xlane.xlu1 %1311 }
 0x331   : > { %v1512_v57 = vmul.bf16 1069105081, %v1461_v27  ;;  %v2134_v0 = vpop.eup %2133  ;;  %v1509_v9 = vmul.bf16 1069105081, %v1460_v60  ;;  %v1401_v10 = vsub.f32 %v2646_v5, %v1312_v12  ;;  %v1400_v34 = vsub.f32 %v2644_v4, %v1312_v12  ;;  %v3056_v12 = vld [vmem:[#allocation28_spill] sm:$0xff]  ;;  %v3057_v60 = vld [vmem:[#allocation27_spill] sm:$0xff] }
 0x332   : > { %1614 = vmatprep.subr.bf16.mxu0 %v2134_v0  ;;  %v2136_v8 = vpop.eup %2135 }
 0x333   : > { %2141 = vpow.bf16 %v1512_v57 }
 0x334   : > { %v1315_v58 = vpop.xlane.xlu1 %1314  ;;  %2143 = vpow.bf16 %v1509_v9 }
 0x335   : > { %v1402_v11 = vsub.f32 %v2648_v6, %v1315_v58  ;;  %v1403_v29 = vsub.f32 %v2650_v7, %v1315_v58  ;;  %v1303_v6 = vpop.xlane.xlu0 %1302 }
 0x336   : > { %v1395_v48 = vsub.f32 %v2634_v63, %v1303_v6  ;;  %v1394_v2 = vsub.f32 %v3056_v12, %v1303_v6 }
 0x337   : > { %v1459_v38 = vpack.c.bf16 %v1403_v29, %v1401_v10  ;;  %v1458_v17 = vpack.c.bf16 %v1402_v11, %v1400_v34  ;;  %v3059_v11 = vld [vmem:[#allocation26_spill] sm:$0xff] }
 0x338   : > { %1615 = vmatpush1.bf16.xpose.msra.mxu0 %v2136_v8  ;;  %v1306_v41 = vpop.xlane.xlu1 %1305 }
 0x339   : > { %v1506_v42 = vmul.bf16 1069105081, %v1459_v38  ;;  %v1397_v45 = vsub.f32 %v2638_v1, %v1306_v41  ;;  %v2138_v22 = vpop.eup %2137  ;;  %v1503_v7 = vmul.bf16 1069105081, %v1458_v17  ;;  %v1396_v47 = vsub.f32 %v2636_v21, %v1306_v41  ;;  %v1297_v56 = vpop.xlane.xlu0 %1296 }
 0x33a   : > { %1616 = vmatprep.subr.bf16.mxu0 %v2138_v22  ;;  %v2140_v3 = vpop.eup %2139  ;;  %v1391_v63 = vsub.f32 %v3057_v60, %v1297_v56 }
 0x33b   : > { %v1457_v23 = vpack.c.bf16 %v1399_v36, %v1397_v45  ;;  %2145 = vpow.bf16 %v1506_v42  ;;  %v1456_v1 = vpack.c.bf16 %v1398_v44, %v1396_v47 }
 0x33c   : > { %v1300_v5 = vpop.xlane.xlu1 %1299  ;;  %2147 = vpow.bf16 %v1503_v7 }
 0x33d   : > { %v1500_v4 = vmul.bf16 1069105081, %v1457_v23  ;;  %v1393_v16 = vsub.f32 %v2630_v62, %v1300_v5  ;;  %v1497_v13 = vmul.bf16 1069105081, %v1456_v1  ;;  %v1392_v21 = vsub.f32 %v2628_v61, %v1300_v5  ;;  %v3060_v5 = vld [vmem:[#allocation39_spill] sm:$0xff] }
 0x33e   : > { %v1390_v61 = vsub.f32 %v3059_v11, %v1297_v56 }
 0x33f   : > { %2149 = vpow.bf16 %v1500_v4  ;;  %v1455_v51 = vpack.c.bf16 %v1395_v48, %v1393_v16  ;;  %v1454_v57 = vpack.c.bf16 %v1394_v2, %v1392_v21 }
 0x340   : > { %1617 = vmatpush1.bf16.xpose.msra.mxu0 %v2140_v3  ;;  %v1294_v53 = vpop.xlane.xlu1 %1293  ;;  %2151 = vpow.bf16 %v1497_v13 }
 0x341   : > { %v2142_v50 = vpop.eup %2141  ;;  %v1494_v14 = vmul.bf16 1069105081, %v1455_v51  ;;  %v1389_v62 = vsub.f32 %v3055_v15, %v1294_v53  ;;  %v1388_v9 = vsub.f32 %v3058_v26, %v1294_v53  ;;  %v1491_v10 = vmul.bf16 1069105081, %v1454_v57 }
 0x342   : > { %1618 = vmatprep.subr.bf16.mxu0 %v2142_v50  ;;  %v2144_v27 = vpop.eup %2143 }
 0x343   : > { %2153 = vpow.bf16 %v1494_v14  ;;  %v1453_v58 = vpack.c.bf16 %v1391_v63, %v1389_v62  ;;  %v1452_v38 = vpack.c.bf16 %v1390_v61, %v1388_v9 }
 0x344   : > { %2155 = vpow.bf16 %v1491_v10 }
 0x345   : > { %v1488_v29 = vmul.bf16 1069105081, %v1453_v58  ;;  %v1485_v36 = vmul.bf16 1069105081, %v1452_v38 }
 0x347   : > { %2157 = vpow.bf16 %v1488_v29 }
 0x348   : > { %1619 = vmatpush1.bf16.xpose.msra.mxu0 %v2144_v27  ;;  %2159 = vpow.bf16 %v1485_v36 }
 0x349   : > { %v2146_v0 = vpop.eup %2145 }
 0x34a   : > { %1620 = vmatprep.subr.bf16.mxu0 %v2146_v0  ;;  %v2148_v8 = vpop.eup %2147 }
 0x34d   : > { %v2150_v34 = vpop.eup %2149 }
 0x34e   : > { %v2152_v17 = vpop.eup %2151 }
 0x350   : > { %1621 = vmatpush1.bf16.xpose.msra.mxu0 %v2148_v8 }
 0x351   : > { %1622 = vmatprep.subr.bf16.mxu0 %v2150_v34  ;;  %v2154_v42 = vpop.eup %2153 }
 0x354   : > { %v1384_v41 = vpop.xlane.xlu1 %1383 }
 0x355   : > { %v1448_v23 = vsub.f32 %v2772_v25, %v1384_v41  ;;  %v1449_v6 = vsub.f32 %v3060_v5, %v1384_v41  ;;  %v2156_v25 = vpop.eup %2155 }
 0x356   : > { %v2158_v13 = vpop.eup %2157 }
 0x357   : > { %v2160_v2 = vpop.eup %2159 }
 0x358   : > { %1623 = vmatpush1.bf16.xpose.msra.mxu0 %v2152_v17  ;;  %v1378_v45 = vpop.xlane.xlu1 %1377  ;;  %v1387_v22 = vpop.xlane.xlu0 %1386 }
 0x359   : > { %1624 = vmatprep.subr.bf16.mxu0 %v2154_v42  ;;  %v1450_v7 = vsub.f32 %v2778_v20, %v1387_v22  ;;  %v1451_v47 = vsub.f32 %v2780_v59, %v1387_v22  ;;  %v1445_v50 = vsub.f32 %v2766_v18, %v1378_v45  ;;  %v1444_v56 = vsub.f32 %v2764_v30, %v1378_v45 }
 0x35b   : > { %v1482_v4 = vpack.c.bf16 %v1450_v7, %v1448_v23  ;;  %v1483_v16 = vpack.c.bf16 %v1451_v47, %v1449_v6 }
 0x35c   : > { %v1372_v3 = vpop.xlane.xlu1 %1371  ;;  %v1381_v44 = vpop.xlane.xlu0 %1380 }
 0x35d   : > { %v1575_v48 = vmul.bf16 1069105081, %v1482_v4  ;;  %v1578_v1 = vmul.bf16 1069105081, %v1483_v16  ;;  %v1446_v51 = vsub.f32 %v2768_v35, %v1381_v44  ;;  %v1447_v53 = vsub.f32 %v2770_v55, %v1381_v44  ;;  %v3061_v16 = vld [vmem:[#allocation38_spill] sm:$0xff] }
 0x35e   : > { %v1441_v14 = vsub.f32 %v2758_v39, %v1372_v3  ;;  %v1440_v57 = vsub.f32 %v2756_v28, %v1372_v3 }
 0x35f   : > { %2161 = vpow.bf16 %v1575_v48  ;;  %v1481_v20 = vpack.c.bf16 %v1447_v53, %v1445_v50  ;;  %v1480_v15 = vpack.c.bf16 %v1446_v51, %v1444_v56  ;;  %v3064_v50 = vld [vmem:[#allocation17_spill] sm:$0xff] }
 0x360   : > { %2163 = vpow.bf16 %v1578_v1  ;;  %1625 = vmatpush1.bf16.xpose.msra.mxu0 %v2156_v25  ;;  %v1366_v59 = vpop.xlane.xlu1 %1365  ;;  %v1375_v21 = vpop.xlane.xlu0 %1374  ;;  %v3063_v1 = vld [vmem:[#allocation15_spill] sm:$0xff]  ;;  %v3065_v53 = vld [vmem:[#allocation37_spill] sm:$0xff] }
 0x361   : > { %1626 = vmatprep.subr.bf16.mxu0 %v2158_v13  ;;  %v1443_v18 = vsub.f32 %v2762_v46, %v1375_v21  ;;  %v1572_v62 = vmul.bf16 1069105081, %v1481_v20  ;;  %v1569_v12 = vmul.bf16 1069105081, %v1480_v15  ;;  %v1442_v30 = vsub.f32 %v2760_v32, %v1375_v21  ;;  %v3066_v13 = vld [vmem:[#allocation34_spill] sm:$0xff] }
 0x362   : > { %v1437_v39 = vsub.f32 %v2746_v52, %v1366_v59  ;;  %v1436_v28 = vsub.f32 %v2744_v49, %v1366_v59 }
 0x363   : > { %v1479_v35 = vpack.c.bf16 %v1443_v18, %v1441_v14  ;;  %2165 = vpow.bf16 %v1572_v62  ;;  %v1478_v46 = vpack.c.bf16 %v1442_v30, %v1440_v57  ;;  %v3067_v18 = vld [vmem:[#allocation35_spill] sm:$0xff]  ;;  %v3069_v30 = vld [vmem:[#allocation33_spill] sm:$0xff] }
 0x364   : > { %v1360_v27 = vpop.xlane.xlu1 %1359  ;;  %v1369_v55 = vpop.xlane.xlu0 %1368  ;;  %2167 = vpow.bf16 %v1569_v12 }
 0x365   : > { %v1566_v60 = vmul.bf16 1069105081, %v1479_v35  ;;  %v1439_v63 = vsub.f32 %v2752_v37, %v1369_v55  ;;  %v1563_v11 = vmul.bf16 1069105081, %v1478_v46  ;;  %v1438_v32 = vsub.f32 %v2750_v24, %v1369_v55 }
 0x366   : > { %v1433_v52 = vsub.f32 %v2734_v33, %v1360_v27  ;;  %v1432_v22 = vsub.f32 %v2732_v31, %v1360_v27  ;;  %v3068_v27 = vld [vmem:[#allocation32_spill] sm:$0xff] }
 0x367   : > { %2169 = vpow.bf16 %v1566_v60  ;;  %v1477_v26 = vpack.c.bf16 %v1439_v63, %v1437_v39  ;;  %v1476_v34 = vpack.c.bf16 %v1438_v32, %v1436_v28  ;;  %v3070_v63 = vld [vmem:[#allocation30_spill] sm:$0xff] }
 0x368   : > { %1627 = vmatpush1.bf16.xpose.msra.mxu0 %v2160_v2  ;;  %v1363_v0 = vpop.xlane.xlu0 %1362  ;;  %v1354_v58 = vpop.xlane.xlu1 %1353  ;;  %2171 = vpow.bf16 %v1563_v11  ;;  %v3072_v11 = vld [vmem:[#allocation29_spill] sm:$0xff] }
 0x369   : > { %v1560_v29 = vmul.bf16 1069105081, %v1477_v26  ;;  %v1435_v37 = vsub.f32 %v2740_v43, %v1363_v0  ;;  %v1557_v17 = vmul.bf16 1069105081, %v1476_v34  ;;  %v1434_v24 = vsub.f32 %v2738_v40, %v1363_v0 }
 0x36a   : > { %v1429_v33 = vsub.f32 %v2722_v54, %v1354_v58  ;;  %v1428_v25 = vsub.f32 %v3065_v53, %v1354_v58  ;;  %v3071_v58 = vld [vmem:[#allocation31_spill] sm:$0xff] }
 0x36b   : > { %2173 = vpow.bf16 %v1560_v29  ;;  %v1475_v38 = vpack.c.bf16 %v1435_v37, %v1433_v52  ;;  %v1474_v6 = vpack.c.bf16 %v1434_v24, %v1432_v22  ;;  %v3076_v22 = vld [vmem:[#allocation19_spill] sm:$0xff] }
 0x36c   : > { %v1357_v9 = vpop.xlane.xlu0 %1356  ;;  %v1348_v8 = vpop.xlane.xlu1 %1347  ;;  %2175 = vpow.bf16 %v1557_v17  ;;  %v3073_v17 = vld [vmem:[#allocation16_spill] sm:$0xff] }
 0x36d   : > { %v2162_v10 = vpop.eup %2161  ;;  %v1554_v45 = vmul.bf16 1069105081, %v1475_v38  ;;  %v1431_v43 = vsub.f32 %v2728_v19, %v1357_v9  ;;  %v1551_v40 = vmul.bf16 1069105081, %v1474_v6  ;;  %v1430_v3 = vsub.f32 %v3061_v16, %v1357_v9  ;;  %v3062_v19 = vld [vmem:[#allocation36_spill] sm:$0xff]  ;;  %v3078_v16 = vld [vmem:[#allocation23_spill] sm:$0xff] }
 0x36e   : > { %v2164_v61 = vpop.eup %2163  ;;  %v1425_v20 = vsub.f32 %v3066_v13, %v1348_v8  ;;  %v1424_v2 = vsub.f32 %v3069_v30, %v1348_v8 }
 0x36f   : > { %1628 = vmatprep.subr.bf16.mxu0 %v2164_v61  ;;  %2177 = vpow.bf16 %v1554_v45  ;;  %v1473_v7 = vpack.c.bf16 %v1431_v43, %v1429_v33  ;;  %v1472_v21 = vpack.c.bf16 %v1430_v3, %v1428_v25  ;;  %v3075_v43 = vld [vmem:[#allocation14_spill] sm:$0xff] }
 0x370   : > { %1629 = vmatpush2.bf16.xpose.msra.mxu0 %v2162_v10  ;;  %v1351_v36 = vpop.xlane.xlu0 %1350  ;;  %v1342_v42 = vpop.xlane.xlu1 %1341  ;;  %2179 = vpow.bf16 %v1551_v40 }
 0x371   : > { %v2166_v41 = vpop.eup %2165  ;;  %v1548_v44 = vmul.bf16 1069105081, %v1473_v7  ;;  %v1427_v48 = vsub.f32 %v3062_v19, %v1351_v36  ;;  %v1545_v15 = vmul.bf16 1069105081, %v1472_v21  ;;  %v1426_v62 = vsub.f32 %v3067_v18, %v1351_v36  ;;  %v3077_v7 = vld [vmem:[#allocation20_spill] sm:$0xff] }
 0x372   : > { %1630 = vmatprep.subr.bf16.mxu0 %v2166_v41  ;;  %v2168_v49 = vpop.eup %2167  ;;  %v1421_v57 = vsub.f32 %v3070_v63, %v1342_v42  ;;  %v1420_v32 = vsub.f32 %v3072_v11, %v1342_v42  ;;  %v3074_v42 = vld [vmem:[#allocation21_spill] sm:$0xff]  ;;  %v1675_v18 = vlaneseq  ;;  %v2200_v11 = vld [vmem:[%s2476_s22 + $0x8] sm:$0xff] }
 0x373   : > { %2181 = vpow.bf16 %v1548_v44  ;;  %v1471_v14 = vpack.c.bf16 %v1427_v48, %v1425_v20  ;;  %v1470_v39 = vpack.c.bf16 %v1426_v62, %v1424_v2  ;;  %v3079_v44 = vld [vmem:[#allocation18_spill] sm:$0xff] }
 0x374   : > { %v1345_v5 = vpop.xlane.xlu0 %1344  ;;  %v554_v47 = vpop.permute.xlu1 %553  ;;  %2183 = vpow.bf16 %v1545_v15 }
 0x375   : > { %v2170_v23 = vpop.eup %2169  ;;  %v635_v31 = vadd.f32 %v3063_v1, %v554_v47  ;;  %v1542_v35 = vmul.bf16 1069105081, %v1471_v14  ;;  %v1423_v55 = vsub.f32 %v3068_v27, %v1345_v5  ;;  %v1539_v46 = vmul.bf16 1069105081, %v1470_v39 }
 0x376   : > { %v2172_v54 = vpop.eup %2171  ;;  %v1422_v26 = vsub.f32 %v3071_v58, %v1345_v5  ;;  %v1676_v27 = vshrl.u32 %v1675_v18, 7  ;;  %v2198_v58 = vld [vmem:[%s2476_s22 + $0x10] sm:$0xff] }
 0x377   : > { %2185 = vpow.bf16 %v1542_v35  ;;  %v1469_v0 = vpack.c.bf16 %v1423_v55, %v1421_v57  ;;  %v2197_v57 = vld [vmem:[%s2476_s22] sm:$0xff] }
 0x378   : > { %1631 = vmatpush2.bf16.xpose.msra.mxu0 %v2168_v49  ;;  %2187 = vpow.bf16 %v1539_v46  ;;  %v1468_v29 = vpack.c.bf16 %v1422_v26, %v1420_v32  ;;  %v564_v38 = vpop.permute.xlu1 %563  ;;  %v633_v49 = vadd.f32 %v3075_v43, %v554_v47  ;;  %v1677_v30 = vsub.s32 0, %v1676_v27 }
 0x379   : > { %1632 = vmatprep.subr.bf16.mxu0 %v2170_v23  ;;  %v2174_v56 = vpop.eup %2173  ;;  %v1536_v9 = vmul.bf16 1069105081, %v1469_v0  ;;  %v645_v23 = vadd.f32 %v3076_v22, %v564_v38  ;;  %v643_v19 = vadd.f32 %v3079_v44, %v564_v38 }
 0x37a   : > { %v2176_v12 = vpop.eup %2175  ;;  %v1533_v37 = vmul.bf16 1069105081, %v1468_v29 }
 0x37b   : > { %2189 = vpow.bf16 %v1536_v9  ;;  %v2199_v9 = vld [vmem:[%s2476_s22 + $0x30] sm:$0xff] }
 0x37c   : > { %v559_v4 = vpop.permute.xlu0 %558  ;;  %2191 = vpow.bf16 %v1533_v37  ;;  %v569_v41 = vpop.permute.xlu1 %568 }
 0x37d   : > { %v639_v51 = vadd.f32 %v3064_v50, %v559_v4  ;;  %v2178_v60 = vpop.eup %2177  ;;  %v637_v24 = vadd.f32 %v3073_v17, %v559_v4  ;;  %v649_v45 = vadd.f32 %v3074_v42, %v569_v41  ;;  %v647_v40 = vadd.f32 %v3077_v7, %v569_v41  ;;  %v3080_v4 = vld [vmem:[#allocation22_spill] sm:$0xff] }
 0x37e   : > { %v2180_v10 = vpop.eup %2179  ;;  %v2204_v17 = vld [vmem:[%s2476_s22 + $0x28] sm:$0xff] }
 0x37f   : > { %v1989_v59 = vpack.c.bf16 %v639_v51, %v635_v31  ;;  %v1988_v33 = vpack.c.bf16 %v637_v24, %v633_v49  ;;  %v1991_v5 = vpack.c.bf16 %v649_v45, %v645_v23  ;;  %v1990_v48 = vpack.c.bf16 %v647_v40, %v643_v19 }
 0x380   : > { %1633 = vmatpush2.bf16.xpose.msra.mxu0 %v2172_v54  ;;  %v574_v6 = vpop.permute.xlu0 %573  ;;  %v1698_v21 = vpop.permute.xlu1 %1697 }
 0x381   : > { %1634 = vmatprep.subr.bf16.mxu0 %v2174_v56  ;;  %1644 = vmatprep.mubr.bf16.mxu0 %v1989_v59  ;;  %v2182_v61 = vpop.eup %2181  ;;  %v655_v3 = vadd.f32 %v3078_v16, %v574_v6  ;;  %v653_v31 = vadd.f32 %v3080_v4, %v574_v6  ;;  %v1715_v39 = vmul.f32 %v2197_v57, %v1698_v21 }
 0x382   : > { %v2184_v28 = vpop.eup %2183  ;;  %v1716_v32 = vmul.f32 %v2200_v11, %v1698_v21 }
 0x383   : > { %v1993_v1 = vpack.c.bf16 %v655_v3, %v655_v3  ;;  %v1992_v47 = vpack.c.bf16 %v653_v31, %v653_v31 }
 0x384   : > { %v1703_v14 = vpop.permute.xlu0 %1702 }
 0x385   : > { %v2186_v8 = vpop.eup %2185  ;;  %v1717_v26 = vmul.f32 %v2198_v58, %v1703_v14 }
 0x386   : > { %v2188_v52 = vpop.eup %2187 }
 0x388   : > { %1635 = vmatpush2.bf16.xpose.msra.mxu0 %v2176_v12  ;;  %v1713_v55 = vpop.permute.xlu0 %1712  ;;  %v1708_v12 = vpop.permute.xlu1 %1707 }
 0x389   : > { %1636 = vmatprep.subr.bf16.mxu0 %v2178_v60  ;;  %v2190_v34 = vpop.eup %2189  ;;  %v1720_v24 = vmul.f32 %v2204_v17, %v1708_v12 }
 0x38a   : > { %v2192_v36 = vpop.eup %2191 }
 0x38c   : > { %v1743_v60 = vpop.permute.xlu0 %1742  ;;  %v1738_v63 = vpop.permute.xlu1 %1737 }
 0x390   : > { %1637 = vmatpush2.bf16.xpose.msra.mxu0 %v2180_v10  ;;  %v1721_v10 = vmul.f32 %v2199_v9, %v1713_v55  ;;  %v1753_v23 = vpop.permute.xlu0 %1752 }
 0x391   : > { %1638 = vmatprep.subr.bf16.mxu0 %v2182_v61  ;;  %v2201_v61 = vld [vmem:[%s2476_s22 + $0x20] sm:$0xff] }
 0x392   : > { %v1719_v29 = vmul.f32 %v2201_v61, %v1708_v12 }
 0x398   : > { %1639 = vmatpush2.bf16.xpose.msra.mxu0 %v2184_v28 }
 0x399   : > { %1640 = vmatprep.subr.bf16.mxu0 %v2186_v8 }
 0x3a0   : > { %1641 = vmatpush2.bf16.xpose.msra.mxu0 %v2188_v52 }
 0x3a1   : > { %1642 = vmatprep.subr.bf16.mxu0 %v2190_v34  ;;  %v2202_v34 = vld [vmem:[%s2476_s22 + $0x18] sm:$0xff] }
 0x3a2   : > { %v1718_v38 = vmul.f32 %v2202_v34, %v1703_v14 }
 0x3a8   : > { %1643 = vmatpush2.bf16.xpose.msra.mxu0 %v2192_v36  ;;  %v2203_v36 = vld [vmem:[%s2476_s22 + $0x38] sm:$0xff]  ;;  %s1987_s22 = sshll.u32 %s2305_s16, 10 }
 0x3a9   : > { %v1722_v41 = vmul.f32 %v2203_v36, %v1713_v55  ;;  %s2940_s16 = scalar_lea.hbm %s3000_s10, %s1987_s22 }
 0x3af   : > { %1645 = vmatmul.mubr.bf16.vlgmr.msra.gmra.mxu0 %v1988_v33  ;;  %v1748_v33 = vpop.permute.xlu1 %1747 }
 0x3b0   : > { %1654 = vmatprep.mubr.bf16.mxu0 %v1991_v5 }
 0x3b7   : > { %1655 = vmatmul.mubr.bf16.gmra.mxu0 %v1990_v48 }
 0x3b8   : > { %1664 = vmatprep.mubr.bf16.mxu0 %v1993_v1 }
 0x3bf   : > { %1665 = vmatmul.mubr.bf16.gmra.mxu0 %v1992_v47 }
 0x46f   : > { %v1646_v50 = vpop.f32.mrf.mxu0 }
 0x471   : > { %v1648_v51 = vpop.f32.mrf.mxu0 }
 0x473   : > { %v1650_v54 = vpop.f32.mrf.mxu0 }
 0x475   : > { %v1652_v53 = vpop.f32.mrf.mxu0 }
 0x477   : > { %v1656_v25 = vpop.f32.mrf.mxu0 }
 0x479   : > { %v1658_v56 = vpop.f32.mrf.mxu0 }
 0x47b   : > { %v1660_v13 = vpop.f32.mrf.mxu0 }
 0x47d   : > { %v1662_v20 = vpop.f32.mrf.mxu0 }
 0x47f   : > { %v1666_v59 = vpop.f32.mrf.mxu0 }
 0x480   : > { %2193 = vrcp.f32 %v1666_v59 }
 0x481   : > { %v1668_v15 = vpop.f32.mrf.mxu0 }
 0x482   : > { %2195 = vrcp.f32 %v1668_v15 }
 0x483   : > { %v1670_v62 = vpop.f32.mrf.mxu0 }
 0x485   : > { %v1671_v35 = vpop.f32.mrf.mxu0 }
 0x48d   : > { %v2194_v2 = vpop.eup %2193 }
 0x48e   : > { %v1678_v0 = vrot.slane %v2194_v2, %v1677_v30 }
 0x48f   : > { %v2196_v46 = vpop.eup %2195 }
 0x490   : > { %v1683_v37 = vmul.f32 %v1678_v0, %v1646_v50  ;;  %v1685_v28 = vmul.f32 %v1678_v0, %v1650_v54  ;;  %v1687_v8 = vmul.f32 %v1678_v0, %v1656_v25  ;;  %v1689_v52 = vmul.f32 %v1678_v0, %v1660_v13 }
 0x491   : > { %v1682_v42 = vrot.slane %v2196_v46, %v1677_v30 }
 0x492   : > { %v1723_v45 = vadd.f32 %v1715_v39, %v1683_v37  ;;  %v1725_v43 = vadd.f32 %v1717_v26, %v1685_v28  ;;  %v1727_v49 = vadd.f32 %v1719_v29, %v1687_v8  ;;  %v1729_v22 = vadd.f32 %v1721_v10, %v1689_v52 }
 0x493   : > { %v1684_v5 = vmul.f32 %v1682_v42, %v1648_v51  ;;  %v1686_v6 = vmul.f32 %v1682_v42, %v1652_v53  ;;  %v1688_v7 = vmul.f32 %v1682_v42, %v1658_v56  ;;  %v1690_v40 = vmul.f32 %v1682_v42, %v1662_v20 }
 0x494   : > { %v1755_v16 = vadd.f32 %v1738_v63, %v1723_v45  ;;  %v1757_v3 = vadd.f32 %v1743_v60, %v1725_v43  ;;  %v1759_v44 = vadd.f32 %v1748_v33, %v1727_v49  ;;  %v1761_v19 = vadd.f32 %v1753_v23, %v1729_v22 }
 0x495   : > { %v1724_v48 = vadd.f32 %v1716_v32, %v1684_v5  ;;  %v1726_v1 = vadd.f32 %v1718_v38, %v1686_v6  ;;  %v1728_v4 = vadd.f32 %v1720_v24, %v1688_v7  ;;  %v1730_v31 = vadd.f32 %v1722_v41, %v1690_v40 }
 0x496   : > { %v1763_v47 = vmax.f32 %v1755_v16, 0.0  ;;  %v1765_v50 = vmax.f32 %v1757_v3, 0.0  ;;  %v1767_v54 = vmax.f32 %v1759_v44, 0.0  ;;  %v1769_v25 = vmax.f32 %v1761_v19, 0.0 }
 0x497   : > { %v1756_v51 = vadd.f32 %v1738_v63, %v1724_v48  ;;  %v1758_v53 = vadd.f32 %v1743_v60, %v1726_v1  ;;  %v1760_v56 = vadd.f32 %v1748_v33, %v1728_v4  ;;  %v1762_v13 = vadd.f32 %v1753_v23, %v1730_v31 }
 0x498   : > { %1771 = vst [vmem:[%s431_s11] sm:$0xff] %v1763_v47  ;;  %1773 = vst [vmem:[%s431_s11 + $0x10] sm:$0xff] %v1765_v50 }
 0x499   : > { %1775 = vst [vmem:[%s431_s11 + $0x20] sm:$0xff] %v1767_v54  ;;  %1777 = vst [vmem:[%s431_s11 + $0x30] sm:$0xff] %v1769_v25  ;;  %v1764_v20 = vmax.f32 %v1756_v51, 0.0  ;;  %v1766_v59 = vmax.f32 %v1758_v53, 0.0  ;;  %v1768_v21 = vmax.f32 %v1760_v56, 0.0  ;;  %v1770_v14 = vmax.f32 %v1762_v13, 0.0 }
 0x49b   : > { %1772 = vst [vmem:[%s431_s11 + $0x8] sm:$0xff] %v1764_v20  ;;  %1774 = vst [vmem:[%s431_s11 + $0x18] sm:$0xff] %v1766_v59 }
 0x49c   : > { %1776 = vst [vmem:[%s431_s11 + $0x28] sm:$0xff] %v1768_v21  ;;  %1778 = vst [vmem:[%s431_s11 + $0x38] sm:$0xff] %v1770_v14 }
 0x49d   : > { %2246 = shalt.err (!%p2243_p7)
}
 0x49e   : > { %s2247_s23 = scalar_lea.hbm %s2940_s16, 1024  ;;  %s2251_s22 = scalar_lea.hbm %s3000_s10, 2048 }
 0x49f   : > { %p2248_p10 = scmp.ne.s32.totalorder %s2940_s16, %s2247_s23  ;;  %p2252_p2 = scmp.lt.s32.totalorder %s2940_s16, %s3000_s10 }
 0x4a0   : > { %p2253_p12 = scmp.lt.s32.totalorder %s2251_s22, %s2247_s23 }
 0x4a1   : > { %p2249_p4 = pnand %p2248_p10, %p2428_p9 }
 0x4a2   : > { %p2254_p8 = por %p2253_p12, %p2252_p2 }
 0x4a3   : > { %p2250_p13 = pneg %p2249_p4 }
 0x4a5   : > { %p2255_p0 = pnand %p2254_p8, %p2250_p13 }
 0x4a7   : > { %2258 = shalt.err (!%p2255_p0)
}
 0x4a8   : > { %s2320_s24 = smov 256   ;;  %s2321_s25 = smov 16  }
 0x4a9   : > { %2050 = dma.vmem_to_hbm [thread:$0]  (%p2428_p9), %s2942_s13, 1024, %s2940_s16, %s1780_s20, %s2320_s24, %s2320_s24, %s2321_s25  }
 0x4aa PF: > { %s3081_s12 = sld [smem:[#allocation10_spill]]  ;;  %p3082_p1 = scmp.ge.s32.totalorder %s2313_s18, 2 }
 0x4ac   : > { %p2057_p3 = pnand %p3082_p1, %p2435_p11 }
 0x4ae   : > { %p2058_p5 = pneg %p2057_p3 }
 0x4b0   : > { %s1811_s30 = sand.u32 1, %s3081_s12  }
 0x4b1   : > { %s1812_s21 = scalar_lea.sflag [#allocation6], %s1811_s30 }
 0x4b2   : > { %2288 = dma.done.wait (%p2058_p5), %s1812_s21, 1024  }
 0x4b3   : > { %2290 = vsyncadd (%p2058_p5), %s1812_s21, 4294966272  ;;  %s26_s18 = sadd.s32 1, %s2313_s18   ;;  %s3083_s26 = sld [smem:[#allocation13_spill]] }
 0x4b4   : > { %p23_p6 = scmp.ge.s32.totalorder %s26_s18, 4   ;;  %s3084_s16 = sld [smem:[#allocation11_spill]] }
 0x4b5   : > { %s3085_s17 = sld [smem:[#allocation12_spill]]  ;;  %s3086_s13 = smov %s2297_s14 }
 0x4b6   : > { %s3087_s14 = smov %s2301_s15  ;;  %25 = sbr.rel (!%p23_p6) target bundleno = 6 (0x6), region = 112 }
 0x4b9   : > { %s3088_s15 = smov %s3083_s26 }
 0x4bb   :  { %1817 = vsyncpa [#allocation5], 1 }
 0x4bc   :  { %1819 = vsyncpa [#allocation5 + $0x1], 1 }
 0x4bd   :  { %1820 = vsyncpa [#allocation6], 1 }
 0x4be   :  { %1822 = vsyncpa [#allocation6 + $0x1], 1 }

</bundles_post_ra>
